<compile_context>
chip_gen: v5e
topology: v5e:2x2
jax: 0.10.0
libtpu: 0.0.40
codegen_flags: <defaults>
</compile_context>

<pallas_src>
from functools import partial

import jax
import jax.numpy as jnp
from jax.experimental import pallas as pl
from jax.experimental.pallas import tpu as pltpu


# --------------------------------------------------------------------------- #
# JAX-side prep: pad + (for stride>1) space-to-depth phase split + flatten.    #
# Output layout: (N, s*s*Hs*Ws, Cin); phase ph = pi*s + pj occupies rows        #
# [ph*Hs*Ws, (ph+1)*Hs*Ws).  One fused XLA pass over the input (vs 9x im2col). #
# --------------------------------------------------------------------------- #
def _prep_conv_input(x_nhwc, k, s, pad):
    N, H, W, C = x_nhwc.shape
    xp = jnp.pad(x_nhwc, ((0, 0), (pad, pad), (pad, pad), (0, 0)))
    Hp, Wp = H + 2 * pad, W + 2 * pad
    Ho, Wo = (Hp - k) // s + 1, (Wp - k) // s + 1
    if s == 1:
        Hs, Ws = Hp, Wp
        a = xp.reshape(N, Hs * Ws, C)
    else:
        assert Hp % s == 0 and Wp % s == 0, "padded spatial dims must divide stride"
        Hs, Ws = Hp // s, Wp // s
        a = jnp.concatenate(
            [xp[:, pi::s, pj::s, :].reshape(N, Hs * Ws, C)
             for pi in range(s) for pj in range(s)], axis=1)
    return a, (Hs, Ws, Ho, Wo)


def _crop_conv_output(out, Ho, Wo, Ws):
    """Kernel output rows live on the padded-phase grid (r = i*Ws + j); crop j < Wo."""
    N, Mout, Cout = out.shape
    out = jnp.pad(out, ((0, 0), (0, Ho * Ws - Mout), (0, 0)))
    return out.reshape(N, Ho, Ws, Cout)[:, :, :Wo, :]


# --------------------------------------------------------------------------- #
# In-kernel helper: k x k conv as a sum of shifted 2-D matmuls (f32 accum).     #
# All slices are static; no in-kernel reshapes.                                 #
# --------------------------------------------------------------------------- #
def _conv_taps(x2d, w, *, k, s, Ws, HsWs, Mout, Cin):
    acc = None
    for di in range(k):
        for dj in range(k):
            ph = (di % s) * s + (dj % s)
            start = ph * HsWs + (di // s) * Ws + (dj // s)
            a = x2d[start:start + Mout, :]                                  # (Mout, Cin)
            wk = w[(di * k + dj) * Cin:(di * k + dj + 1) * Cin, :]          # (Cin, Cout)
            c = jnp.dot(a, wk, preferred_element_type=jnp.float32)
            acc = c if acc is None else acc + c
    return acc                                                              # (Mout, Cout) f32


# --------------------------------------------------------------------------- #
# Pallas kernel 1: conv(+folded BN) + optional ReLU  (stem / stage convs)       #
# --------------------------------------------------------------------------- #
def _conv_kernel(x_ref, w_ref, b_ref, o_ref, *, k, s, Ws, HsWs, Mout, Cin, apply_relu):
    x = x_ref[0].astype(jnp.float32)                        # (s*s*Hs*Ws, Cin)
    acc = _conv_taps(x, w_ref[...], k=k, s=s, Ws=Ws, HsWs=HsWs, Mout=Mout, Cin=Cin)
    acc = acc + b_ref[...]                                   # (1, Cout) broadcast
    if apply_relu:
        acc = jnp.maximum(acc, 0.0)
    o_ref[0] = acc.astype(o_ref.dtype)


def conv_bn_relu(x_nhwc, w, b, *, k=3, stride=1, pad=1, apply_relu=True,
                 out_dtype=jnp.bfloat16):
    N, H, W, Cin = x_nhwc.shape
    Cout = w.shape[1]
    a, (Hs, Ws, Ho, Wo) = _prep_conv_input(x_nhwc.astype(jnp.bfloat16), k, stride, pad)
    Mout = (Ho - 1) * Ws + Wo
    kern = partial(_conv_kernel, k=k, s=stride, Ws=Ws, HsWs=Hs * Ws, Mout=Mout,
                   Cin=Cin, apply_relu=apply_relu)
    cost = pl.CostEstimate(
        flops=2 * N * Mout * k * k * Cin * Cout,
        transcendentals=0,
        bytes_accessed=N * a.shape[1] * Cin * 2 + w.size * 4
                       + N * Mout * Cout * jnp.dtype(out_dtype).itemsize)
    out = pl.pallas_call(
        kern,
        out_shape=jax.ShapeDtypeStruct((N, Mout, Cout), out_dtype),
        grid=(N,),
        in_specs=[
            pl.BlockSpec((1, a.shape[1], Cin), lambda n: (n, 0, 0)),
            pl.BlockSpec((k * k * Cin, Cout), lambda n: (0, 0)),
            pl.BlockSpec((1, Cout), lambda n: (0, 0)),
        ],
        out_specs=pl.BlockSpec((1, Mout, Cout), lambda n: (n, 0, 0)),
        compiler_params=pltpu.CompilerParams(dimension_semantics=("parallel",)),
        cost_estimate=cost,
    )(a, w, b.reshape(1, Cout))
    return _crop_conv_output(out, Ho, Wo, Ws)


# --------------------------------------------------------------------------- #
# Pallas kernel 2: fused heads — 3x3 conv (both branches) + ReLU, with the two  #
# 1x1 output convs folded into the epilogue (no HBM intermediates).             #
# --------------------------------------------------------------------------- #
def _head_kernel(x_ref, w3_ref, b3_ref, wb_ref, bb_ref, wi_ref, bi_ref,
                 bin_ref, inst_ref, *, k, Ws, HsWs, Mout, Cin):
    x = x_ref[0].astype(jnp.float32)
    t = _conv_taps(x, w3_ref[...], k=k, s=1, Ws=Ws, HsWs=HsWs, Mout=Mout, Cin=Cin)
    t = jnp.maximum(t + b3_ref[...], 0.0)                    # (Mout, 2*Cmid) f32
    bin_ref[0] = (jnp.dot(t, wb_ref[...], preferred_element_type=jnp.float32)
                  + bb_ref[...]).astype(bin_ref.dtype)
    inst_ref[0] = (jnp.dot(t, wi_ref[...], preferred_element_type=jnp.float32)
                   + bi_ref[...]).astype(inst_ref.dtype)


def fused_heads(h_nhwc, params):
    N, H4, W4, Cin = h_nhwc.shape
    Cmid = params["bh_w"].shape[1]
    n_classes = params["bo_w"].shape[1]
    emb_dims = params["io_w"].shape[1]

    # Fuse the two 3x3 head convs along the output-channel axis; zero-pad the 1x1
    # weights so each epilogue matmul reads the full 2*Cmid-wide activation.
    w3 = jnp.concatenate([params["bh_w"], params["ih_w"]], axis=1)            # (9*Cin, 2*Cmid)
    b3 = jnp.concatenate([params["bh_b"], params["ih_b"]]).reshape(1, -1)
    wb = jnp.concatenate([params["bo_w"],
                          jnp.zeros((Cmid, n_classes), jnp.float32)], axis=0)  # (2*Cmid, nc)
    wi = jnp.concatenate([jnp.zeros((Cmid, emb_dims), jnp.float32),
                          params["io_w"]], axis=0)                             # (2*Cmid, E)
    bb = params["bo_b"].reshape(1, -1)
    bi = params["io_b"].reshape(1, -1)

    a, (Hs, Ws, Ho, Wo) = _prep_conv_input(h_nhwc.astype(jnp.bfloat16), 3, 1, 1)
    Mout = (Ho - 1) * Ws + Wo
    kern = partial(_head_kernel, k=3, Ws=Ws, HsWs=Hs * Ws, Mout=Mout, Cin=Cin)
    cost = pl.CostEstimate(
        flops=2 * N * Mout * (9 * Cin * 2 * Cmid + 2 * Cmid * (n_classes + emb_dims)),
        transcendentals=0,
        bytes_accessed=N * a.shape[1] * Cin * 2 + (w3.size + wb.size + wi.size) * 4
                       + N * Mout * (n_classes + emb_dims) * 4)
    bin_s, inst_s = pl.pallas_call(
        kern,
        out_shape=(jax.ShapeDtypeStruct((N, Mout, n_classes), jnp.float32),
                   jax.ShapeDtypeStruct((N, Mout, emb_dims), jnp.float32)),
        grid=(N,),
        in_specs=[
            pl.BlockSpec((1, a.shape[1], Cin), lambda n: (n, 0, 0)),
            pl.BlockSpec(w3.shape, lambda n: (0, 0)),
            pl.BlockSpec((1, 2 * Cmid), lambda n: (0, 0)),
            pl.BlockSpec(wb.shape, lambda n: (0, 0)),
            pl.BlockSpec((1, n_classes), lambda n: (0, 0)),
            pl.BlockSpec(wi.shape, lambda n: (0, 0)),
            pl.BlockSpec((1, emb_dims), lambda n: (0, 0)),
        ],
        out_specs=(pl.BlockSpec((1, Mout, n_classes), lambda n: (n, 0, 0)),
                   pl.BlockSpec((1, Mout, emb_dims), lambda n: (n, 0, 0))),
        compiler_params=pltpu.CompilerParams(dimension_semantics=("parallel",)),
        cost_estimate=cost,
    )(a, w3, b3, wb, bb, wi, bi)
    return (_crop_conv_output(bin_s, Ho, Wo, Ws),
            _crop_conv_output(inst_s, Ho, Wo, Ws))


# --------------------------------------------------------------------------- #
# Pallas kernel 3: LaneNet backend, lane-dense (pixels on the 128-lane axis).   #
# argmax of the raw logits (== argmax of softmax), ReLU pixel embedding.        #
# --------------------------------------------------------------------------- #
def _backend_kernel(bin_ref, inst_ref, pred_ref, emb_ref):
    x = bin_ref[...]                                          # (1, C, TP) f32
    m = jnp.max(x, axis=1, keepdims=True)                     # (1, 1, TP)
    idx = jax.lax.broadcasted_iota(jnp.int32, x.shape, 1)
    cand = jnp.where(x >= m, idx, jnp.int32(x.shape[1]))      # first-index-of-max
    pred_ref[...] = jnp.min(cand, axis=1, keepdims=True)
    emb_ref[...] = jnp.maximum(inst_ref[...], 0.0)            # pix embedding (folded BN + ReLU)


def lanenet_backend(bin_ncp, inst_ncp, tp=512):
    """bin: (N, C, P), inst: (N, E, P) f32 -> pred (N, P) int32, emb (N, E, P) f32."""
    N, C, P = bin_ncp.shape
    E = inst_ncp.shape[1]
    Pp = ((P + 127) // 128) * 128
    if Pp != P:                                               # pads only when needed
        bin_ncp = jnp.pad(bin_ncp, ((0, 0), (0, 0), (0, Pp - P)))
        inst_ncp = jnp.pad(inst_ncp, ((0, 0), (0, 0), (0, Pp - P)))
    tp = min(tp, Pp)
    while Pp % tp:
        tp //= 2
    pred, emb = pl.pallas_call(
        _backend_kernel,
        out_shape=(jax.ShapeDtypeStruct((N, 1, Pp), jnp.int32),
                   jax.ShapeDtypeStruct((N, E, Pp), jnp.float32)),
        grid=(N, Pp // tp),
        in_specs=[pl.BlockSpec((1, C, tp), lambda n, j: (n, 0, j)),
                  pl.BlockSpec((1, E, tp), lambda n, j: (n, 0, j))],
        out_specs=(pl.BlockSpec((1, 1, tp), lambda n, j: (n, 0, j)),
                   pl.BlockSpec((1, E, tp), lambda n, j: (n, 0, j))),
        compiler_params=pltpu.CompilerParams(
            dimension_semantics=("parallel", "parallel")),
    )(bin_ncp, inst_ncp)
    return pred[:, 0, :P], emb[:, :, :P]


# --------------------------------------------------------------------------- #
# Parameters (deterministic, synthetic; BN folded into conv weight/bias)        #
# --------------------------------------------------------------------------- #
def init_params(key, n_classes, embedding_dims, c_in=3, c_stem=16, c_stage=32):
    ks = jax.random.split(key, 12)

    def w(k, shape, scale=0.1):
        return scale * jax.random.normal(k, shape, dtype=jnp.float32)

    return {
        "stem_w": w(ks[0], (3 * 3 * c_in, c_stem)),     "stem_b": w(ks[1], (c_stem,), 0.01),
        "stage_w": w(ks[2], (3 * 3 * c_stem, c_stage)), "stage_b": w(ks[3], (c_stage,), 0.01),
        "bh_w": w(ks[4], (3 * 3 * c_stage, c_stage)),   "bh_b": w(ks[5], (c_stage,), 0.01),
        "bo_w": w(ks[6], (c_stage, n_classes)),         "bo_b": w(ks[7], (n_classes,), 0.01),
        "ih_w": w(ks[8], (3 * 3 * c_stage, c_stage)),   "ih_b": w(ks[9], (c_stage,), 0.01),
        "io_w": w(ks[10], (c_stage, embedding_dims)),   "io_b": w(ks[11], (embedding_dims,), 0.01),
    }


# --------------------------------------------------------------------------- #
# CombinedModel.forward                                                         #
# --------------------------------------------------------------------------- #
def combined_model_forward(params, x_nchw):
    N, _, H, W = x_nchw.shape
    n_classes = params["bo_w"].shape[1]
    emb_dims = params["io_w"].shape[1]
    x = jnp.transpose(x_nchw, (0, 2, 3, 1))                   # NCHW -> NHWC

    # --- simplified BiSeNetV2 trunk (stride-2 x2 => H/4, W/4) ---
    h = conv_bn_relu(x, params["stem_w"], params["stem_b"], k=3, stride=2, pad=1)
    h = conv_bn_relu(h, params["stage_w"], params["stage_b"], k=3, stride=2, pad=1)

    # --- fused segmentation + instance heads (single Pallas kernel) ---
    bin_small, inst_small = fused_heads(h, params)            # NHWC, H/4 x W/4, f32

    # TODO(synk): F.interpolate(mode='bilinear', align_corners=False) upsample kept in
    # plain JAX (interpolation glue); done in NCHW, which is also the output layout.
    bin_logits = jax.image.resize(jnp.transpose(bin_small, (0, 3, 1, 2)),
                                  (N, n_classes, H, W), method="bilinear")
    inst_logits = jax.image.resize(jnp.transpose(inst_small, (0, 3, 1, 2)),
                                   (N, emb_dims, H, W), method="bilinear")

    # --- LaneNet backend (fused, lane-dense Pallas kernel) ---
    P = H * W
    pred, emb = lanenet_backend(bin_logits.reshape(N, n_classes, P),
                                inst_logits.reshape(N, emb_dims, P))

    binary_seg_prediction = pred.reshape(N, H, W)             # (N, H, W) int32
    instance_seg_prediction = emb.reshape(N, emb_dims, H, W)  # (N, emb_dims, H, W)
    return bin_logits, inst_logits, binary_seg_prediction, instance_seg_prediction


if __name__ == "__main__":
    n_classes = 2
    embedding_dims = 4
    key = jax.random.PRNGKey(0)
    k_param, k_x = jax.random.split(key)

    params = init_params(k_param, n_classes, embedding_dims)
    x = jax.random.normal(k_x, (2, 3, 16, 16), dtype=jnp.float32)      # NCHW like PyTorch

    fwd = jax.jit(partial(combined_model_forward, params))
    outs = fwd(x)
    outs = jax.block_until_ready(outs)

    bin_logits, inst_logits, bin_pred, inst_pred = outs
    assert bin_logits.shape == (2, n_classes, 16, 16)
    assert inst_logits.shape == (2, embedding_dims, 16, 16)
    assert bin_pred.shape == (2, 16, 16) and bin_pred.dtype == jnp.int32
    assert inst_pred.shape == (2, embedding_dims, 16, 16)
    assert int(bin_pred.min()) >= 0 and int(bin_pred.max()) < n_classes
    assert float(inst_pred.min()) >= 0.0                               # ReLU'd embedding

    print("KERNEL_OK")
</pallas_src>

<mosaic_0001>
module attributes {stable_mosaic.version = 11 : i64} {
  func.func @_conv_kernel(%arg0: i32, %arg1: memref<1x324x3xbf16, #tpu.memory_space<vmem>>, %arg2: memref<27x16xf32, #tpu.memory_space<vmem>>, %arg3: memref<1x16xf32, #tpu.memory_space<vmem>>, %arg4: memref<1x71x16xbf16, #tpu.memory_space<vmem>>) attributes {dimension_semantics = [#tpu.dimension_semantics<parallel>], iteration_bounds = array<i64: 2>, scalar_prefetch = 0 : i64, scratch_operands = 0 : i64, tpu.core_type = #tpu.core_type<tc>, window_params = [{transform_indices = @transform_0, window_bounds = array<i64: 1, 324, 3>}, {pipeline_mode = #tpu.pipeline_mode<synchronous>, transform_indices = @transform_1, window_bounds = array<i64: 27, 16>}, {pipeline_mode = #tpu.pipeline_mode<synchronous>, transform_indices = @transform_2, window_bounds = array<i64: 1, 16>}, {transform_indices = @transform_3, window_bounds = array<i64: 1, 71, 16>}]} {
    %c0 = arith.constant 0 : index
    %c0_0 = arith.constant 0 : index
    %c0_1 = arith.constant 0 : index
    %0 = vector.load %arg1[%c0, %c0_0, %c0_1] : memref<1x324x3xbf16, #tpu.memory_space<vmem>>, vector<1x324x3xbf16>
    %1 = vector.shape_cast %0 : vector<1x324x3xbf16> to vector<324x3xbf16>
    %2 = arith.extf %1 : vector<324x3xbf16> to vector<324x3xf32>
    %c0_2 = arith.constant 0 : index
    %c0_3 = arith.constant 0 : index
    %3 = vector.load %arg2[%c0_2, %c0_3] : memref<27x16xf32, #tpu.memory_space<vmem>>, vector<27x16xf32>
    %4 = vector.extract_strided_slice %2 {offsets = [0, 0], sizes = [71, 3], strides = [1, 1]} : vector<324x3xf32> to vector<71x3xf32>
    %5 = vector.extract_strided_slice %3 {offsets = [0, 0], sizes = [3, 16], strides = [1, 1]} : vector<27x16xf32> to vector<3x16xf32>
    %cst = arith.constant dense<0.000000e+00> : vector<71x16xf32>
    %6 = tpu.matmul %4, %5, %cst {dimension_numbers = #tpu.dot_dimension_numbers<[1], [0], [0], [1], [0, 0, 1, 1], [], []>} : vector<71x3xf32>, vector<3x16xf32>, vector<71x16xf32> -> vector<71x16xf32>
    %7 = vector.extract_strided_slice %2 {offsets = [81, 0], sizes = [71, 3], strides = [1, 1]} : vector<324x3xf32> to vector<71x3xf32>
    %8 = vector.extract_strided_slice %3 {offsets = [3, 0], sizes = [3, 16], strides = [1, 1]} : vector<27x16xf32> to vector<3x16xf32>
    %cst_4 = arith.constant dense<0.000000e+00> : vector<71x16xf32>
    %9 = tpu.matmul %7, %8, %cst_4 {dimension_numbers = #tpu.dot_dimension_numbers<[1], [0], [0], [1], [0, 0, 1, 1], [], []>} : vector<71x3xf32>, vector<3x16xf32>, vector<71x16xf32> -> vector<71x16xf32>
    %10 = arith.addf %6, %9 : vector<71x16xf32>
    %11 = vector.extract_strided_slice %2 {offsets = [1, 0], sizes = [71, 3], strides = [1, 1]} : vector<324x3xf32> to vector<71x3xf32>
    %12 = vector.extract_strided_slice %3 {offsets = [6, 0], sizes = [3, 16], strides = [1, 1]} : vector<27x16xf32> to vector<3x16xf32>
    %cst_5 = arith.constant dense<0.000000e+00> : vector<71x16xf32>
    %13 = tpu.matmul %11, %12, %cst_5 {dimension_numbers = #tpu.dot_dimension_numbers<[1], [0], [0], [1], [0, 0, 1, 1], [], []>} : vector<71x3xf32>, vector<3x16xf32>, vector<71x16xf32> -> vector<71x16xf32>
    %14 = arith.addf %10, %13 : vector<71x16xf32>
    %15 = vector.extract_strided_slice %2 {offsets = [162, 0], sizes = [71, 3], strides = [1, 1]} : vector<324x3xf32> to vector<71x3xf32>
    %16 = vector.extract_strided_slice %3 {offsets = [9, 0], sizes = [3, 16], strides = [1, 1]} : vector<27x16xf32> to vector<3x16xf32>
    %cst_6 = arith.constant dense<0.000000e+00> : vector<71x16xf32>
    %17 = tpu.matmul %15, %16, %cst_6 {dimension_numbers = #tpu.dot_dimension_numbers<[1], [0], [0], [1], [0, 0, 1, 1], [], []>} : vector<71x3xf32>, vector<3x16xf32>, vector<71x16xf32> -> vector<71x16xf32>
    %18 = arith.addf %14, %17 : vector<71x16xf32>
    %19 = vector.extract_strided_slice %2 {offsets = [243, 0], sizes = [71, 3], strides = [1, 1]} : vector<324x3xf32> to vector<71x3xf32>
    %20 = vector.extract_strided_slice %3 {offsets = [12, 0], sizes = [3, 16], strides = [1, 1]} : vector<27x16xf32> to vector<3x16xf32>
    %cst_7 = arith.constant dense<0.000000e+00> : vector<71x16xf32>
    %21 = tpu.matmul %19, %20, %cst_7 {dimension_numbers = #tpu.dot_dimension_numbers<[1], [0], [0], [1], [0, 0, 1, 1], [], []>} : vector<71x3xf32>, vector<3x16xf32>, vector<71x16xf32> -> vector<71x16xf32>
    %22 = arith.addf %18, %21 : vector<71x16xf32>
    %23 = vector.extract_strided_slice %2 {offsets = [163, 0], sizes = [71, 3], strides = [1, 1]} : vector<324x3xf32> to vector<71x3xf32>
    %24 = vector.extract_strided_slice %3 {offsets = [15, 0], sizes = [3, 16], strides = [1, 1]} : vector<27x16xf32> to vector<3x16xf32>
    %cst_8 = arith.constant dense<0.000000e+00> : vector<71x16xf32>
    %25 = tpu.matmul %23, %24, %cst_8 {dimension_numbers = #tpu.dot_dimension_numbers<[1], [0], [0], [1], [0, 0, 1, 1], [], []>} : vector<71x3xf32>, vector<3x16xf32>, vector<71x16xf32> -> vector<71x16xf32>
    %26 = arith.addf %22, %25 : vector<71x16xf32>
    %27 = vector.extract_strided_slice %2 {offsets = [9, 0], sizes = [71, 3], strides = [1, 1]} : vector<324x3xf32> to vector<71x3xf32>
    %28 = vector.extract_strided_slice %3 {offsets = [18, 0], sizes = [3, 16], strides = [1, 1]} : vector<27x16xf32> to vector<3x16xf32>
    %cst_9 = arith.constant dense<0.000000e+00> : vector<71x16xf32>
    %29 = tpu.matmul %27, %28, %cst_9 {dimension_numbers = #tpu.dot_dimension_numbers<[1], [0], [0], [1], [0, 0, 1, 1], [], []>} : vector<71x3xf32>, vector<3x16xf32>, vector<71x16xf32> -> vector<71x16xf32>
    %30 = arith.addf %26, %29 : vector<71x16xf32>
    %31 = vector.extract_strided_slice %2 {offsets = [90, 0], sizes = [71, 3], strides = [1, 1]} : vector<324x3xf32> to vector<71x3xf32>
    %32 = vector.extract_strided_slice %3 {offsets = [21, 0], sizes = [3, 16], strides = [1, 1]} : vector<27x16xf32> to vector<3x16xf32>
    %cst_10 = arith.constant dense<0.000000e+00> : vector<71x16xf32>
    %33 = tpu.matmul %31, %32, %cst_10 {dimension_numbers = #tpu.dot_dimension_numbers<[1], [0], [0], [1], [0, 0, 1, 1], [], []>} : vector<71x3xf32>, vector<3x16xf32>, vector<71x16xf32> -> vector<71x16xf32>
    %34 = arith.addf %30, %33 : vector<71x16xf32>
    %35 = vector.extract_strided_slice %2 {offsets = [10, 0], sizes = [71, 3], strides = [1, 1]} : vector<324x3xf32> to vector<71x3xf32>
    %36 = vector.extract_strided_slice %3 {offsets = [24, 0], sizes = [3, 16], strides = [1, 1]} : vector<27x16xf32> to vector<3x16xf32>
    %cst_11 = arith.constant dense<0.000000e+00> : vector<71x16xf32>
    %37 = tpu.matmul %35, %36, %cst_11 {dimension_numbers = #tpu.dot_dimension_numbers<[1], [0], [0], [1], [0, 0, 1, 1], [], []>} : vector<71x3xf32>, vector<3x16xf32>, vector<71x16xf32> -> vector<71x16xf32>
    %38 = arith.addf %34, %37 : vector<71x16xf32>
    %c0_12 = arith.constant 0 : index
    %c0_13 = arith.constant 0 : index
    %39 = vector.load %arg3[%c0_12, %c0_13] : memref<1x16xf32, #tpu.memory_space<vmem>>, vector<1x16xf32>
    %40 = vector.broadcast %39 : vector<1x16xf32> to vector<71x16xf32>
    %41 = arith.addf %38, %40 : vector<71x16xf32>
    %cst_14 = arith.constant 0.000000e+00 : f32
    %42 = vector.broadcast %cst_14 : f32 to vector<71x16xf32>
    %43 = arith.maximumf %41, %42 : vector<71x16xf32>
    %44 = arith.truncf %43 : vector<71x16xf32> to vector<71x16xbf16>
    %c0_15 = arith.constant 0 : index
    %c0_16 = arith.constant 0 : index
    %c0_17 = arith.constant 0 : index
    %45 = vector.load %arg4[%c0_15, %c0_16, %c0_17] : memref<1x71x16xbf16, #tpu.memory_space<vmem>>, vector<1x71x16xbf16>
    %46 = vector.shape_cast %45 : vector<1x71x16xbf16> to vector<71x16xbf16>
    %47 = vector.shape_cast %44 : vector<71x16xbf16> to vector<1x71x16xbf16>
    tpu.vector_store %arg4[%c0_15, %c0_16, %c0_17], %47 {strides = array<i32>} : memref<1x71x16xbf16, #tpu.memory_space<vmem>>, vector<1x71x16xbf16>,
    return
  }
  func.func @transform_0(%arg0: i32) -> (i32, i32, i32) {
    %c0_i32 = arith.constant 0 : i32
    %c0_i32_0 = arith.constant 0 : i32
    %c0_i32_1 = arith.constant 0 : i32
    return %arg0, %c0_i32, %c0_i32_0 : i32, i32, i32
  }
  func.func @transform_1(%arg0: i32) -> (i32, i32) {
    %c0_i32 = arith.constant 0 : i32
    %c0_i32_0 = arith.constant 0 : i32
    %c0_i32_1 = arith.constant 0 : i32
    return %c0_i32, %c0_i32_0 : i32, i32
  }
  func.func @transform_2(%arg0: i32) -> (i32, i32) {
    %c0_i32 = arith.constant 0 : i32
    %c0_i32_0 = arith.constant 0 : i32
    %c0_i32_1 = arith.constant 0 : i32
    return %c0_i32, %c0_i32_0 : i32, i32
  }
  func.func @transform_3(%arg0: i32) -> (i32, i32, i32) {
    %c0_i32 = arith.constant 0 : i32
    %c0_i32_0 = arith.constant 0 : i32
    %c0_i32_1 = arith.constant 0 : i32
    return %arg0, %c0_i32, %c0_i32_0 : i32, i32, i32
  }
}

module attributes {stable_mosaic.version = 11 : i64} {
  func.func @_conv_kernel(%arg0: i32, %arg1: memref<1x100x16xbf16, #tpu.memory_space<vmem>>, %arg2: memref<144x32xf32, #tpu.memory_space<vmem>>, %arg3: memref<1x32xf32, #tpu.memory_space<vmem>>, %arg4: memref<1x19x32xbf16, #tpu.memory_space<vmem>>) attributes {dimension_semantics = [#tpu.dimension_semantics<parallel>], iteration_bounds = array<i64: 2>, scalar_prefetch = 0 : i64, scratch_operands = 0 : i64, tpu.core_type = #tpu.core_type<tc>, window_params = [{transform_indices = @transform_0, window_bounds = array<i64: 1, 100, 16>}, {pipeline_mode = #tpu.pipeline_mode<synchronous>, transform_indices = @transform_1, window_bounds = array<i64: 144, 32>}, {pipeline_mode = #tpu.pipeline_mode<synchronous>, transform_indices = @transform_2, window_bounds = array<i64: 1, 32>}, {transform_indices = @transform_3, window_bounds = array<i64: 1, 19, 32>}]} {
    %c0 = arith.constant 0 : index
    %c0_0 = arith.constant 0 : index
    %c0_1 = arith.constant 0 : index
    %0 = vector.load %arg1[%c0, %c0_0, %c0_1] : memref<1x100x16xbf16, #tpu.memory_space<vmem>>, vector<1x100x16xbf16>
    %1 = vector.shape_cast %0 : vector<1x100x16xbf16> to vector<100x16xbf16>
    %2 = arith.extf %1 : vector<100x16xbf16> to vector<100x16xf32>
    %c0_2 = arith.constant 0 : index
    %c0_3 = arith.constant 0 : index
    %3 = vector.load %arg2[%c0_2, %c0_3] : memref<144x32xf32, #tpu.memory_space<vmem>>, vector<144x32xf32>
    %4 = vector.extract_strided_slice %2 {offsets = [0, 0], sizes = [19, 16], strides = [1, 1]} : vector<100x16xf32> to vector<19x16xf32>
    %5 = vector.extract_strided_slice %3 {offsets = [0, 0], sizes = [16, 32], strides = [1, 1]} : vector<144x32xf32> to vector<16x32xf32>
    %cst = arith.constant dense<0.000000e+00> : vector<19x32xf32>
    %6 = tpu.matmul %4, %5, %cst {dimension_numbers = #tpu.dot_dimension_numbers<[1], [0], [0], [1], [0, 0, 1, 1], [], []>} : vector<19x16xf32>, vector<16x32xf32>, vector<19x32xf32> -> vector<19x32xf32>
    %7 = vector.extract_strided_slice %2 {offsets = [25, 0], sizes = [19, 16], strides = [1, 1]} : vector<100x16xf32> to vector<19x16xf32>
    %8 = vector.extract_strided_slice %3 {offsets = [16, 0], sizes = [16, 32], strides = [1, 1]} : vector<144x32xf32> to vector<16x32xf32>
    %cst_4 = arith.constant dense<0.000000e+00> : vector<19x32xf32>
    %9 = tpu.matmul %7, %8, %cst_4 {dimension_numbers = #tpu.dot_dimension_numbers<[1], [0], [0], [1], [0, 0, 1, 1], [], []>} : vector<19x16xf32>, vector<16x32xf32>, vector<19x32xf32> -> vector<19x32xf32>
    %10 = arith.addf %6, %9 : vector<19x32xf32>
    %11 = vector.extract_strided_slice %2 {offsets = [1, 0], sizes = [19, 16], strides = [1, 1]} : vector<100x16xf32> to vector<19x16xf32>
    %12 = vector.extract_strided_slice %3 {offsets = [32, 0], sizes = [16, 32], strides = [1, 1]} : vector<144x32xf32> to vector<16x32xf32>
    %cst_5 = arith.constant dense<0.000000e+00> : vector<19x32xf32>
    %13 = tpu.matmul %11, %12, %cst_5 {dimension_numbers = #tpu.dot_dimension_numbers<[1], [0], [0], [1], [0, 0, 1, 1], [], []>} : vector<19x16xf32>, vector<16x32xf32>, vector<19x32xf32> -> vector<19x32xf32>
    %14 = arith.addf %10, %13 : vector<19x32xf32>
    %15 = vector.extract_strided_slice %2 {offsets = [50, 0], sizes = [19, 16], strides = [1, 1]} : vector<100x16xf32> to vector<19x16xf32>
    %16 = vector.extract_strided_slice %3 {offsets = [48, 0], sizes = [16, 32], strides = [1, 1]} : vector<144x32xf32> to vector<16x32xf32>
    %cst_6 = arith.constant dense<0.000000e+00> : vector<19x32xf32>
    %17 = tpu.matmul %15, %16, %cst_6 {dimension_numbers = #tpu.dot_dimension_numbers<[1], [0], [0], [1], [0, 0, 1, 1], [], []>} : vector<19x16xf32>, vector<16x32xf32>, vector<19x32xf32> -> vector<19x32xf32>
    %18 = arith.addf %14, %17 : vector<19x32xf32>
    %19 = vector.extract_strided_slice %2 {offsets = [75, 0], sizes = [19, 16], strides = [1, 1]} : vector<100x16xf32> to vector<19x16xf32>
    %20 = vector.extract_strided_slice %3 {offsets = [64, 0], sizes = [16, 32], strides = [1, 1]} : vector<144x32xf32> to vector<16x32xf32>
    %cst_7 = arith.constant dense<0.000000e+00> : vector<19x32xf32>
    %21 = tpu.matmul %19, %20, %cst_7 {dimension_numbers = #tpu.dot_dimension_numbers<[1], [0], [0], [1], [0, 0, 1, 1], [], []>} : vector<19x16xf32>, vector<16x32xf32>, vector<19x32xf32> -> vector<19x32xf32>
    %22 = arith.addf %18, %21 : vector<19x32xf32>
    %23 = vector.extract_strided_slice %2 {offsets = [51, 0], sizes = [19, 16], strides = [1, 1]} : vector<100x16xf32> to vector<19x16xf32>
    %24 = vector.extract_strided_slice %3 {offsets = [80, 0], sizes = [16, 32], strides = [1, 1]} : vector<144x32xf32> to vector<16x32xf32>
    %cst_8 = arith.constant dense<0.000000e+00> : vector<19x32xf32>
    %25 = tpu.matmul %23, %24, %cst_8 {dimension_numbers = #tpu.dot_dimension_numbers<[1], [0], [0], [1], [0, 0, 1, 1], [], []>} : vector<19x16xf32>, vector<16x32xf32>, vector<19x32xf32> -> vector<19x32xf32>
    %26 = arith.addf %22, %25 : vector<19x32xf32>
    %27 = vector.extract_strided_slice %2 {offsets = [5, 0], sizes = [19, 16], strides = [1, 1]} : vector<100x16xf32> to vector<19x16xf32>
    %28 = vector.extract_strided_slice %3 {offsets = [96, 0], sizes = [16, 32], strides = [1, 1]} : vector<144x32xf32> to vector<16x32xf32>
    %cst_9 = arith.constant dense<0.000000e+00> : vector<19x32xf32>
    %29 = tpu.matmul %27, %28, %cst_9 {dimension_numbers = #tpu.dot_dimension_numbers<[1], [0], [0], [1], [0, 0, 1, 1], [], []>} : vector<19x16xf32>, vector<16x32xf32>, vector<19x32xf32> -> vector<19x32xf32>
    %30 = arith.addf %26, %29 : vector<19x32xf32>
    %31 = vector.extract_strided_slice %2 {offsets = [30, 0], sizes = [19, 16], strides = [1, 1]} : vector<100x16xf32> to vector<19x16xf32>
    %32 = vector.extract_strided_slice %3 {offsets = [112, 0], sizes = [16, 32], strides = [1, 1]} : vector<144x32xf32> to vector<16x32xf32>
    %cst_10 = arith.constant dense<0.000000e+00> : vector<19x32xf32>
    %33 = tpu.matmul %31, %32, %cst_10 {dimension_numbers = #tpu.dot_dimension_numbers<[1], [0], [0], [1], [0, 0, 1, 1], [], []>} : vector<19x16xf32>, vector<16x32xf32>, vector<19x32xf32> -> vector<19x32xf32>
    %34 = arith.addf %30, %33 : vector<19x32xf32>
    %35 = vector.extract_strided_slice %2 {offsets = [6, 0], sizes = [19, 16], strides = [1, 1]} : vector<100x16xf32> to vector<19x16xf32>
    %36 = vector.extract_strided_slice %3 {offsets = [128, 0], sizes = [16, 32], strides = [1, 1]} : vector<144x32xf32> to vector<16x32xf32>
    %cst_11 = arith.constant dense<0.000000e+00> : vector<19x32xf32>
    %37 = tpu.matmul %35, %36, %cst_11 {dimension_numbers = #tpu.dot_dimension_numbers<[1], [0], [0], [1], [0, 0, 1, 1], [], []>} : vector<19x16xf32>, vector<16x32xf32>, vector<19x32xf32> -> vector<19x32xf32>
    %38 = arith.addf %34, %37 : vector<19x32xf32>
    %c0_12 = arith.constant 0 : index
    %c0_13 = arith.constant 0 : index
    %39 = vector.load %arg3[%c0_12, %c0_13] : memref<1x32xf32, #tpu.memory_space<vmem>>, vector<1x32xf32>
    %40 = vector.broadcast %39 : vector<1x32xf32> to vector<19x32xf32>
    %41 = arith.addf %38, %40 : vector<19x32xf32>
    %cst_14 = arith.constant 0.000000e+00 : f32
    %42 = vector.broadcast %cst_14 : f32 to vector<19x32xf32>
    %43 = arith.maximumf %41, %42 : vector<19x32xf32>
    %44 = arith.truncf %43 : vector<19x32xf32> to vector<19x32xbf16>
    %c0_15 = arith.constant 0 : index
    %c0_16 = arith.constant 0 : index
    %c0_17 = arith.constant 0 : index
    %45 = vector.load %arg4[%c0_15, %c0_16, %c0_17] : memref<1x19x32xbf16, #tpu.memory_space<vmem>>, vector<1x19x32xbf16>
    %46 = vector.shape_cast %45 : vector<1x19x32xbf16> to vector<19x32xbf16>
    %47 = vector.shape_cast %44 : vector<19x32xbf16> to vector<1x19x32xbf16>
    tpu.vector_store %arg4[%c0_15, %c0_16, %c0_17], %47 {strides = array<i32>} : memref<1x19x32xbf16, #tpu.memory_space<vmem>>, vector<1x19x32xbf16>,
    return
  }
  func.func @transform_0(%arg0: i32) -> (i32, i32, i32) {
    %c0_i32 = arith.constant 0 : i32
    %c0_i32_0 = arith.constant 0 : i32
    %c0_i32_1 = arith.constant 0 : i32
    return %arg0, %c0_i32, %c0_i32_0 : i32, i32, i32
  }
  func.func @transform_1(%arg0: i32) -> (i32, i32) {
    %c0_i32 = arith.constant 0 : i32
    %c0_i32_0 = arith.constant 0 : i32
    %c0_i32_1 = arith.constant 0 : i32
    return %c0_i32, %c0_i32_0 : i32, i32
  }
  func.func @transform_2(%arg0: i32) -> (i32, i32) {
    %c0_i32 = arith.constant 0 : i32
    %c0_i32_0 = arith.constant 0 : i32
    %c0_i32_1 = arith.constant 0 : i32
    return %c0_i32, %c0_i32_0 : i32, i32
  }
  func.func @transform_3(%arg0: i32) -> (i32, i32, i32) {
    %c0_i32 = arith.constant 0 : i32
    %c0_i32_0 = arith.constant 0 : i32
    %c0_i32_1 = arith.constant 0 : i32
    return %arg0, %c0_i32, %c0_i32_0 : i32, i32, i32
  }
}

module attributes {stable_mosaic.version = 11 : i64} {
  func.func @_head_kernel(%arg0: i32, %arg1: memref<1x36x32xbf16, #tpu.memory_space<vmem>>, %arg2: memref<288x64xf32, #tpu.memory_space<vmem>>, %arg3: memref<1x64xf32, #tpu.memory_space<vmem>>, %arg4: memref<64x2xf32, #tpu.memory_space<vmem>>, %arg5: memref<1x2xf32, #tpu.memory_space<vmem>>, %arg6: memref<64x4xf32, #tpu.memory_space<vmem>>, %arg7: memref<1x4xf32, #tpu.memory_space<vmem>>, %arg8: memref<1x22x2xf32, #tpu.memory_space<vmem>>, %arg9: memref<1x22x4xf32, #tpu.memory_space<vmem>>) attributes {dimension_semantics = [#tpu.dimension_semantics<parallel>], iteration_bounds = array<i64: 2>, scalar_prefetch = 0 : i64, scratch_operands = 0 : i64, tpu.core_type = #tpu.core_type<tc>, window_params = [{transform_indices = @transform_0, window_bounds = array<i64: 1, 36, 32>}, {pipeline_mode = #tpu.pipeline_mode<synchronous>, transform_indices = @transform_1, window_bounds = array<i64: 288, 64>}, {pipeline_mode = #tpu.pipeline_mode<synchronous>, transform_indices = @transform_2, window_bounds = array<i64: 1, 64>}, {pipeline_mode = #tpu.pipeline_mode<synchronous>, transform_indices = @transform_3, window_bounds = array<i64: 64, 2>}, {pipeline_mode = #tpu.pipeline_mode<synchronous>, transform_indices = @transform_4, window_bounds = array<i64: 1, 2>}, {pipeline_mode = #tpu.pipeline_mode<synchronous>, transform_indices = @transform_5, window_bounds = array<i64: 64, 4>}, {pipeline_mode = #tpu.pipeline_mode<synchronous>, transform_indices = @transform_6, window_bounds = array<i64: 1, 4>}, {transform_indices = @transform_7, window_bounds = array<i64: 1, 22, 2>}, {transform_indices = @transform_8, window_bounds = array<i64: 1, 22, 4>}]} {
    %c0 = arith.constant 0 : index
    %c0_0 = arith.constant 0 : index
    %c0_1 = arith.constant 0 : index
    %0 = vector.load %arg1[%c0, %c0_0, %c0_1] : memref<1x36x32xbf16, #tpu.memory_space<vmem>>, vector<1x36x32xbf16>
    %1 = vector.shape_cast %0 : vector<1x36x32xbf16> to vector<36x32xbf16>
    %2 = arith.extf %1 : vector<36x32xbf16> to vector<36x32xf32>
    %c0_2 = arith.constant 0 : index
    %c0_3 = arith.constant 0 : index
    %3 = vector.load %arg2[%c0_2, %c0_3] : memref<288x64xf32, #tpu.memory_space<vmem>>, vector<288x64xf32>
    %4 = vector.extract_strided_slice %2 {offsets = [0, 0], sizes = [22, 32], strides = [1, 1]} : vector<36x32xf32> to vector<22x32xf32>
    %5 = vector.extract_strided_slice %3 {offsets = [0, 0], sizes = [32, 64], strides = [1, 1]} : vector<288x64xf32> to vector<32x64xf32>
    %cst = arith.constant dense<0.000000e+00> : vector<22x64xf32>
    %6 = tpu.matmul %4, %5, %cst {dimension_numbers = #tpu.dot_dimension_numbers<[1], [0], [0], [1], [0, 0, 1, 1], [], []>} : vector<22x32xf32>, vector<32x64xf32>, vector<22x64xf32> -> vector<22x64xf32>
    %7 = vector.extract_strided_slice %2 {offsets = [1, 0], sizes = [22, 32], strides = [1, 1]} : vector<36x32xf32> to vector<22x32xf32>
    %8 = vector.extract_strided_slice %3 {offsets = [32, 0], sizes = [32, 64], strides = [1, 1]} : vector<288x64xf32> to vector<32x64xf32>
    %cst_4 = arith.constant dense<0.000000e+00> : vector<22x64xf32>
    %9 = tpu.matmul %7, %8, %cst_4 {dimension_numbers = #tpu.dot_dimension_numbers<[1], [0], [0], [1], [0, 0, 1, 1], [], []>} : vector<22x32xf32>, vector<32x64xf32>, vector<22x64xf32> -> vector<22x64xf32>
    %10 = arith.addf %6, %9 : vector<22x64xf32>
    %11 = vector.extract_strided_slice %2 {offsets = [2, 0], sizes = [22, 32], strides = [1, 1]} : vector<36x32xf32> to vector<22x32xf32>
    %12 = vector.extract_strided_slice %3 {offsets = [64, 0], sizes = [32, 64], strides = [1, 1]} : vector<288x64xf32> to vector<32x64xf32>
    %cst_5 = arith.constant dense<0.000000e+00> : vector<22x64xf32>
    %13 = tpu.matmul %11, %12, %cst_5 {dimension_numbers = #tpu.dot_dimension_numbers<[1], [0], [0], [1], [0, 0, 1, 1], [], []>} : vector<22x32xf32>, vector<32x64xf32>, vector<22x64xf32> -> vector<22x64xf32>
    %14 = arith.addf %10, %13 : vector<22x64xf32>
    %15 = vector.extract_strided_slice %2 {offsets = [6, 0], sizes = [22, 32], strides = [1, 1]} : vector<36x32xf32> to vector<22x32xf32>
    %16 = vector.extract_strided_slice %3 {offsets = [96, 0], sizes = [32, 64], strides = [1, 1]} : vector<288x64xf32> to vector<32x64xf32>
    %cst_6 = arith.constant dense<0.000000e+00> : vector<22x64xf32>
    %17 = tpu.matmul %15, %16, %cst_6 {dimension_numbers = #tpu.dot_dimension_numbers<[1], [0], [0], [1], [0, 0, 1, 1], [], []>} : vector<22x32xf32>, vector<32x64xf32>, vector<22x64xf32> -> vector<22x64xf32>
    %18 = arith.addf %14, %17 : vector<22x64xf32>
    %19 = vector.extract_strided_slice %2 {offsets = [7, 0], sizes = [22, 32], strides = [1, 1]} : vector<36x32xf32> to vector<22x32xf32>
    %20 = vector.extract_strided_slice %3 {offsets = [128, 0], sizes = [32, 64], strides = [1, 1]} : vector<288x64xf32> to vector<32x64xf32>
    %cst_7 = arith.constant dense<0.000000e+00> : vector<22x64xf32>
    %21 = tpu.matmul %19, %20, %cst_7 {dimension_numbers = #tpu.dot_dimension_numbers<[1], [0], [0], [1], [0, 0, 1, 1], [], []>} : vector<22x32xf32>, vector<32x64xf32>, vector<22x64xf32> -> vector<22x64xf32>
    %22 = arith.addf %18, %21 : vector<22x64xf32>
    %23 = vector.extract_strided_slice %2 {offsets = [8, 0], sizes = [22, 32], strides = [1, 1]} : vector<36x32xf32> to vector<22x32xf32>
    %24 = vector.extract_strided_slice %3 {offsets = [160, 0], sizes = [32, 64], strides = [1, 1]} : vector<288x64xf32> to vector<32x64xf32>
    %cst_8 = arith.constant dense<0.000000e+00> : vector<22x64xf32>
    %25 = tpu.matmul %23, %24, %cst_8 {dimension_numbers = #tpu.dot_dimension_numbers<[1], [0], [0], [1], [0, 0, 1, 1], [], []>} : vector<22x32xf32>, vector<32x64xf32>, vector<22x64xf32> -> vector<22x64xf32>
    %26 = arith.addf %22, %25 : vector<22x64xf32>
    %27 = vector.extract_strided_slice %2 {offsets = [12, 0], sizes = [22, 32], strides = [1, 1]} : vector<36x32xf32> to vector<22x32xf32>
    %28 = vector.extract_strided_slice %3 {offsets = [192, 0], sizes = [32, 64], strides = [1, 1]} : vector<288x64xf32> to vector<32x64xf32>
    %cst_9 = arith.constant dense<0.000000e+00> : vector<22x64xf32>
    %29 = tpu.matmul %27, %28, %cst_9 {dimension_numbers = #tpu.dot_dimension_numbers<[1], [0], [0], [1], [0, 0, 1, 1], [], []>} : vector<22x32xf32>, vector<32x64xf32>, vector<22x64xf32> -> vector<22x64xf32>
    %30 = arith.addf %26, %29 : vector<22x64xf32>
    %31 = vector.extract_strided_slice %2 {offsets = [13, 0], sizes = [22, 32], strides = [1, 1]} : vector<36x32xf32> to vector<22x32xf32>
    %32 = vector.extract_strided_slice %3 {offsets = [224, 0], sizes = [32, 64], strides = [1, 1]} : vector<288x64xf32> to vector<32x64xf32>
    %cst_10 = arith.constant dense<0.000000e+00> : vector<22x64xf32>
    %33 = tpu.matmul %31, %32, %cst_10 {dimension_numbers = #tpu.dot_dimension_numbers<[1], [0], [0], [1], [0, 0, 1, 1], [], []>} : vector<22x32xf32>, vector<32x64xf32>, vector<22x64xf32> -> vector<22x64xf32>
    %34 = arith.addf %30, %33 : vector<22x64xf32>
    %35 = vector.extract_strided_slice %2 {offsets = [14, 0], sizes = [22, 32], strides = [1, 1]} : vector<36x32xf32> to vector<22x32xf32>
    %36 = vector.extract_strided_slice %3 {offsets = [256, 0], sizes = [32, 64], strides = [1, 1]} : vector<288x64xf32> to vector<32x64xf32>
    %cst_11 = arith.constant dense<0.000000e+00> : vector<22x64xf32>
    %37 = tpu.matmul %35, %36, %cst_11 {dimension_numbers = #tpu.dot_dimension_numbers<[1], [0], [0], [1], [0, 0, 1, 1], [], []>} : vector<22x32xf32>, vector<32x64xf32>, vector<22x64xf32> -> vector<22x64xf32>
    %38 = arith.addf %34, %37 : vector<22x64xf32>
    %c0_12 = arith.constant 0 : index
    %c0_13 = arith.constant 0 : index
    %39 = vector.load %arg3[%c0_12, %c0_13] : memref<1x64xf32, #tpu.memory_space<vmem>>, vector<1x64xf32>
    %40 = vector.broadcast %39 : vector<1x64xf32> to vector<22x64xf32>
    %41 = arith.addf %38, %40 : vector<22x64xf32>
    %cst_14 = arith.constant 0.000000e+00 : f32
    %42 = vector.broadcast %cst_14 : f32 to vector<22x64xf32>
    %43 = arith.maximumf %41, %42 : vector<22x64xf32>
    %c0_15 = arith.constant 0 : index
    %c0_16 = arith.constant 0 : index
    %44 = vector.load %arg4[%c0_15, %c0_16] : memref<64x2xf32, #tpu.memory_space<vmem>>, vector<64x2xf32>
    %cst_17 = arith.constant dense<0.000000e+00> : vector<22x2xf32>
    %45 = tpu.matmul %43, %44, %cst_17 {dimension_numbers = #tpu.dot_dimension_numbers<[1], [0], [0], [1], [0, 0, 1, 1], [], []>} : vector<22x64xf32>, vector<64x2xf32>, vector<22x2xf32> -> vector<22x2xf32>
    %c0_18 = arith.constant 0 : index
    %c0_19 = arith.constant 0 : index
    %46 = vector.load %arg5[%c0_18, %c0_19] : memref<1x2xf32, #tpu.memory_space<vmem>>, vector<1x2xf32>
    %47 = vector.broadcast %46 : vector<1x2xf32> to vector<22x2xf32>
    %48 = arith.addf %45, %47 : vector<22x2xf32>
    %c0_20 = arith.constant 0 : index
    %c0_21 = arith.constant 0 : index
    %c0_22 = arith.constant 0 : index
    %49 = vector.load %arg8[%c0_20, %c0_21, %c0_22] : memref<1x22x2xf32, #tpu.memory_space<vmem>>, vector<1x22x2xf32>
    %50 = vector.shape_cast %49 : vector<1x22x2xf32> to vector<22x2xf32>
    %51 = vector.shape_cast %48 : vector<22x2xf32> to vector<1x22x2xf32>
    tpu.vector_store %arg8[%c0_20, %c0_21, %c0_22], %51 {strides = array<i32>} : memref<1x22x2xf32, #tpu.memory_space<vmem>>, vector<1x22x2xf32>,
    %c0_23 = arith.constant 0 : index
    %c0_24 = arith.constant 0 : index
    %52 = vector.load %arg6[%c0_23, %c0_24] : memref<64x4xf32, #tpu.memory_space<vmem>>, vector<64x4xf32>
    %cst_25 = arith.constant dense<0.000000e+00> : vector<22x4xf32>
    %53 = tpu.matmul %43, %52, %cst_25 {dimension_numbers = #tpu.dot_dimension_numbers<[1], [0], [0], [1], [0, 0, 1, 1], [], []>} : vector<22x64xf32>, vector<64x4xf32>, vector<22x4xf32> -> vector<22x4xf32>
    %c0_26 = arith.constant 0 : index
    %c0_27 = arith.constant 0 : index
    %54 = vector.load %arg7[%c0_26, %c0_27] : memref<1x4xf32, #tpu.memory_space<vmem>>, vector<1x4xf32>
    %55 = vector.broadcast %54 : vector<1x4xf32> to vector<22x4xf32>
    %56 = arith.addf %53, %55 : vector<22x4xf32>
    %c0_28 = arith.constant 0 : index
    %c0_29 = arith.constant 0 : index
    %c0_30 = arith.constant 0 : index
    %57 = vector.load %arg9[%c0_28, %c0_29, %c0_30] : memref<1x22x4xf32, #tpu.memory_space<vmem>>, vector<1x22x4xf32>
    %58 = vector.shape_cast %57 : vector<1x22x4xf32> to vector<22x4xf32>
    %59 = vector.shape_cast %56 : vector<22x4xf32> to vector<1x22x4xf32>
    tpu.vector_store %arg9[%c0_28, %c0_29, %c0_30], %59 {strides = array<i32>} : memref<1x22x4xf32, #tpu.memory_space<vmem>>, vector<1x22x4xf32>,
    return
  }
  func.func @transform_0(%arg0: i32) -> (i32, i32, i32) {
    %c0_i32 = arith.constant 0 : i32
    %c0_i32_0 = arith.constant 0 : i32
    %c0_i32_1 = arith.constant 0 : i32
    return %arg0, %c0_i32, %c0_i32_0 : i32, i32, i32
  }
  func.func @transform_1(%arg0: i32) -> (i32, i32) {
    %c0_i32 = arith.constant 0 : i32
    %c0_i32_0 = arith.constant 0 : i32
    %c0_i32_1 = arith.constant 0 : i32
    return %c0_i32, %c0_i32_0 : i32, i32
  }
  func.func @transform_2(%arg0: i32) -> (i32, i32) {
    %c0_i32 = arith.constant 0 : i32
    %c0_i32_0 = arith.constant 0 : i32
    %c0_i32_1 = arith.constant 0 : i32
    return %c0_i32, %c0_i32_0 : i32, i32
  }
  func.func @transform_3(%arg0: i32) -> (i32, i32) {
    %c0_i32 = arith.constant 0 : i32
    %c0_i32_0 = arith.constant 0 : i32
    %c0_i32_1 = arith.constant 0 : i32
    return %c0_i32, %c0_i32_0 : i32, i32
  }
  func.func @transform_4(%arg0: i32) -> (i32, i32) {
    %c0_i32 = arith.constant 0 : i32
    %c0_i32_0 = arith.constant 0 : i32
    %c0_i32_1 = arith.constant 0 : i32
    return %c0_i32, %c0_i32_0 : i32, i32
  }
  func.func @transform_5(%arg0: i32) -> (i32, i32) {
    %c0_i32 = arith.constant 0 : i32
    %c0_i32_0 = arith.constant 0 : i32
    %c0_i32_1 = arith.constant 0 : i32
    return %c0_i32, %c0_i32_0 : i32, i32
  }
  func.func @transform_6(%arg0: i32) -> (i32, i32) {
    %c0_i32 = arith.constant 0 : i32
    %c0_i32_0 = arith.constant 0 : i32
    %c0_i32_1 = arith.constant 0 : i32
    return %c0_i32, %c0_i32_0 : i32, i32
  }
  func.func @transform_7(%arg0: i32) -> (i32, i32, i32) {
    %c0_i32 = arith.constant 0 : i32
    %c0_i32_0 = arith.constant 0 : i32
    %c0_i32_1 = arith.constant 0 : i32
    return %arg0, %c0_i32, %c0_i32_0 : i32, i32, i32
  }
  func.func @transform_8(%arg0: i32) -> (i32, i32, i32) {
    %c0_i32 = arith.constant 0 : i32
    %c0_i32_0 = arith.constant 0 : i32
    %c0_i32_1 = arith.constant 0 : i32
    return %arg0, %c0_i32, %c0_i32_0 : i32, i32, i32
  }
}

module attributes {stable_mosaic.version = 11 : i64} {
  func.func @_backend_kernel(%arg0: i32, %arg1: i32, %arg2: memref<1x2x256xf32, #tpu.memory_space<vmem>>, %arg3: memref<1x4x256xf32, #tpu.memory_space<vmem>>, %arg4: memref<1x1x256xi32, #tpu.memory_space<vmem>>, %arg5: memref<1x4x256xf32, #tpu.memory_space<vmem>>) attributes {dimension_semantics = [#tpu.dimension_semantics<parallel>, #tpu.dimension_semantics<parallel>], iteration_bounds = array<i64: 2, 1>, scalar_prefetch = 0 : i64, scratch_operands = 0 : i64, tpu.core_type = #tpu.core_type<tc>, window_params = [{transform_indices = @transform_0, window_bounds = array<i64: 1, 2, 256>}, {transform_indices = @transform_1, window_bounds = array<i64: 1, 4, 256>}, {transform_indices = @transform_2, window_bounds = array<i64: 1, 1, 256>}, {transform_indices = @transform_3, window_bounds = array<i64: 1, 4, 256>}]} {
    %c0 = arith.constant 0 : index
    %c0_0 = arith.constant 0 : index
    %c0_1 = arith.constant 0 : index
    %0 = vector.load %arg2[%c0, %c0_0, %c0_1] : memref<1x2x256xf32, #tpu.memory_space<vmem>>, vector<1x2x256xf32>
    %cst = arith.constant dense<0xFF800000> : vector<1x256xf32>
    %1 = vector.multi_reduction <maximumf>, %0, %cst [1] : vector<1x2x256xf32> to vector<1x256xf32>
    %2 = vector.shape_cast %1 : vector<1x256xf32> to vector<1x1x256xf32>
    %3 = tpu.iota {dimensions = array<i32: 1>} : vector<1x2x256xi32>
    %4 = vector.broadcast %2 : vector<1x1x256xf32> to vector<1x2x256xf32>
    %5 = arith.cmpf oge, %0, %4 : vector<1x2x256xf32>
    %c2_i32 = arith.constant 2 : i32
    %6 = vector.broadcast %c2_i32 : i32 to vector<1x2x256xi32>
    %7 = arith.select %5, %3, %6 : vector<1x2x256xi1>, vector<1x2x256xi32>
    %cst_2 = arith.constant dense<2147483647> : vector<1x256xi32>
    %8 = vector.multi_reduction <minsi>, %7, %cst_2 [1] : vector<1x2x256xi32> to vector<1x256xi32>
    %9 = vector.shape_cast %8 : vector<1x256xi32> to vector<1x1x256xi32>
    %c0_3 = arith.constant 0 : index
    %c0_4 = arith.constant 0 : index
    %c0_5 = arith.constant 0 : index
    %10 = vector.load %arg4[%c0_3, %c0_4, %c0_5] : memref<1x1x256xi32, #tpu.memory_space<vmem>>, vector<1x1x256xi32>
    tpu.vector_store %arg4[%c0_3, %c0_4, %c0_5], %9 {strides = array<i32>} : memref<1x1x256xi32, #tpu.memory_space<vmem>>, vector<1x1x256xi32>,
    %c0_6 = arith.constant 0 : index
    %c0_7 = arith.constant 0 : index
    %c0_8 = arith.constant 0 : index
    %11 = vector.load %arg3[%c0_6, %c0_7, %c0_8] : memref<1x4x256xf32, #tpu.memory_space<vmem>>, vector<1x4x256xf32>
    %cst_9 = arith.constant 0.000000e+00 : f32
    %12 = vector.broadcast %cst_9 : f32 to vector<1x4x256xf32>
    %13 = arith.maximumf %11, %12 : vector<1x4x256xf32>
    %c0_10 = arith.constant 0 : index
    %c0_11 = arith.constant 0 : index
    %c0_12 = arith.constant 0 : index
    %14 = vector.load %arg5[%c0_10, %c0_11, %c0_12] : memref<1x4x256xf32, #tpu.memory_space<vmem>>, vector<1x4x256xf32>
    tpu.vector_store %arg5[%c0_10, %c0_11, %c0_12], %13 {strides = array<i32>} : memref<1x4x256xf32, #tpu.memory_space<vmem>>, vector<1x4x256xf32>,
    return
  }
  func.func @transform_0(%arg0: i32, %arg1: i32) -> (i32, i32, i32) {
    %c0_i32 = arith.constant 0 : i32
    %c0_i32_0 = arith.constant 0 : i32
    return %arg0, %c0_i32, %arg1 : i32, i32, i32
  }
  func.func @transform_1(%arg0: i32, %arg1: i32) -> (i32, i32, i32) {
    %c0_i32 = arith.constant 0 : i32
    %c0_i32_0 = arith.constant 0 : i32
    return %arg0, %c0_i32, %arg1 : i32, i32, i32
  }
  func.func @transform_2(%arg0: i32, %arg1: i32) -> (i32, i32, i32) {
    %c0_i32 = arith.constant 0 : i32
    %c0_i32_0 = arith.constant 0 : i32
    return %arg0, %c0_i32, %arg1 : i32, i32, i32
  }
  func.func @transform_3(%arg0: i32, %arg1: i32) -> (i32, i32, i32) {
    %c0_i32 = arith.constant 0 : i32
    %c0_i32_0 = arith.constant 0 : i32
    return %arg0, %c0_i32, %arg1 : i32, i32, i32
  }
}

</mosaic_0001>

<bundles_post_ra>
// kernel: combined_model_forward.4
= control target key start
LH: loop header
LB: loop body
LE: loop exit
PB: predicated region body
PF: predicated region fallthrough
CT: control target
= control target key end

     0   :  { %s1413_s12 = smov 0   ;;  %s1894_s0 = inlined_call_operand.vmem [shape: bf16[2,324,3], index: 0, kind: input, shape index: {}]   ;;  %s1895_s1 = inlined_call_operand.vmem [shape: f32[27,16], index: 1, kind: input, shape index: {}]   ;;  %s1896_s2 = inlined_call_operand.vmem [shape: f32[1,16], index: 2, kind: input, shape index: {}]   ;;  %s1897_s3 = inlined_call_operand.vmem [shape: bf16[2,71,16], index: 3, kind: output, shape index: {}]  }
   0x1 LB: > { %s1173_s13 = sadd.s32 4294967295, %s1391_s12   ;;  %p1177_p0 = scmp.ge.s32.totalorder %s1391_s12, 1  ;;  %s1391_s12 = sphi %s1413_s12, %s13_s12  }
   0x2   : > { %p137_p1 = scmp.lt.s32.totalorder %s1391_s12, 3 }
   0x4   : > { %p138_p2 = pnand %p1177_p0, %p137_p1 }
   0x5   : > { %p161_p3 = scmp.lt.s32.totalorder (!%p138_p2), %s1173_s13, 1 }
   0x6   : > { %141 = sbr.rel (%p138_p2) target bundleno = 327 (0x147), region = 32 }
   0xb   : > { %v251_v0 = vld [vmem:[%s1895_s1] sm:$0xff]  ;;  %vm303_vm0 = vcmask 1042432   ;;  %v252_v1 = vld [vmem:[%s1895_s1 + $0x8] sm:$0xff]  ;;  %vm441_vm1 = vcmask 1041408   ;;  %s1899_s13 = smov (!%p161_p3, %s1173_s13), 1  ;;  %v253_v7 = vld [vmem:[%s1895_s1 + $0x10] sm:$0xff] }
   0xc   : > { %v283_v2 = vrot.slane %v251_v0, 3  ;;  %v442_v3 = vrot.slane %v251_v0, 6  ;;  %v443_v4 = vrot.slane %v252_v1, 6  ;;  %v548_v5 = vrot.slane %v252_v1, 1  ;;  %s1374_s18 = smul.u32 164, %s1899_s13 }
   0xd   : > { %v652_v8 = vrot.slane %v252_v1, 4  ;;  %vm264_vm2 = vcmask 1046528   ;;  %vm284_vm3 = vcmask 23552   ;;  %v826_v12 = vrot.slane %v253_v7, 2  ;;  %v254_v43 = vld [vmem:[%s1895_s1 + $0x18] sm:$0x7] }
   0xe   : > { %1371 = vmatpush.msk.msra.mxu1 %vm303_vm0, %v283_v2  ;;  %1372 = vmatpush.msk.msra.mxu2 %vm303_vm0, %v283_v2  ;;  %v444_v6 = vsel %vm441_vm1, %v442_v3, %v443_v4  ;;  %s1442_s23 = scalar_lea.vmem %s1894_s0, %s1374_s18  ;;  %v747_v13 = vrot.slane %v252_v1, 7  ;;  %v905_v30 = vrot.slane %v253_v7, 5  ;;  %v748_v31 = vrot.slane %v253_v7, 7  ;;  %s1375_s28 = smul.u32 36, %s1899_s13 }
   0xf   : > { %1373 = vmatpush.msk.msra.mxu3 %vm303_vm0, %v283_v2  ;;  %1180 = vmatpush.msk.msra.mxu0 %vm303_vm0, %v283_v2  ;;  %v1446_v9 = vld [vmem:[%s1442_s23 + $0x28] sm:$0xff]   ;;  %v1449_v10 = vld [vmem:[%s1442_s23 + $0x30] sm:$0xff]   ;;  %v1452_v11 = vld [vmem:[%s1442_s23 + $0x38] sm:$0xff]   ;;  %vm746_vm4 = vcmask 1040384   ;;  %vm632_vm5 = vcmask 1044480   ;;  %vm528_vm6 = vcmask 1045504  }
  0x10   : > { %1200 = vmatpush.msk.msrb.mxu2 %vm303_vm0, %v444_v6  ;;  %1190 = vmatpush.msk.msrb.mxu1 %vm303_vm0, %v251_v0  ;;  %v1295_v14 = vunpack.c.h.bf16 %v1446_v9  ;;  %v1298_v15 = vunpack.c.l.bf16 %v1449_v10  ;;  %v1302_v16 = vunpack.c.l.bf16 %v1452_v11  ;;  %v1303_v17 = vunpack.c.h.bf16 %v1452_v11  ;;  %v1460_v18 = vld [vmem:[%s1442_s23 + $0x40] sm:$0xff]   ;;  %v1463_v19 = vld [vmem:[%s1442_s23 + $0x48] sm:$0xff]   ;;  %v1366_v36 = vld [vmem:[%s1442_s23 + $0x78] sm:$0xff]   ;;  %s1855_s4 = scalar_lea.vmem %s1897_s3, %s1375_s28 }
  0x11   : > { %1210 = vmatpush.msk.msrb.mxu3 %vm303_vm0, %v548_v5  ;;  %1220 = vmatpush.msk.msrb.mxu0 %vm303_vm0, %v652_v8  ;;  %v1299_v20 = vunpack.c.h.bf16 %v1449_v10  ;;  %v1306_v21 = vunpack.c.l.bf16 %v1460_v18  ;;  %v1307_v22 = vunpack.c.h.bf16 %v1460_v18  ;;  %v1310_v23 = vunpack.c.l.bf16 %v1463_v19  ;;  %v1498_v41 = vld [vmem:[%s1442_s23 + $0x50] sm:$0xff]   ;;  %v1367_v52 = vld [vmem:[%s1442_s23 + $0x80] sm:$0xff]   ;;  %v1524_v58 = vld [vmem:[%s1442_s23 + $0x58] sm:$0xff]  }
  0x12   : > { %v266_v24 = vrot.slane %v1295_v14, 1  ;;  %v268_v25 = vrot.slane %v1298_v15, 1  ;;  %v272_v26 = vrot.slane %v1302_v16, 1  ;;  %v274_v27 = vrot.slane %v1303_v17, 1  ;;  %v1273_v53 = vld [vmem:[%s1442_s23] sm:$0xff]   ;;  %v1352_v4 = vld [vmem:[%s1442_s23 + $0x8] sm:$0xff]  }
  0x13   : > { %v278_v28 = vrot.slane %v1307_v22, 1  ;;  %v280_v29 = vrot.slane %v1310_v23, 1  ;;  %v1294_v35 = vunpack.c.l.bf16 %v1446_v9  ;;  %v270_v37 = vrot.slane %v1299_v20, 1 }
  0x14   : > { %v269_v32 = vsel %vm264_vm2, %v266_v24, %v268_v25  ;;  %v275_v33 = vsel %vm264_vm2, %v272_v26, %v274_v27  ;;  %v276_v38 = vrot.slane %v1306_v21, 1  ;;  %v749_v40 = vsel %vm746_vm4, %v747_v13, %v748_v31  ;;  %v1557_v31 = vld [vmem:[%s1442_s23 + $0x60] sm:$0xff]  }
  0x15   : > { %1182 = vmatmul.msk.f32.vlgmr.msra.gmra.mxu1 %vm284_vm3, %v269_v32  ;;  %1185 = vmatmul.msk.f32.vlgmr.msra.gmra.mxu2 %vm284_vm3, %v275_v33  ;;  %v281_v34 = vsel %vm264_vm2, %v278_v28, %v280_v29  ;;  %v265_v39 = vrot.slane %v1294_v35, 1  ;;  %v1334_v42 = vunpack.c.l.bf16 %v1366_v36  ;;  %v1335_v45 = vunpack.c.h.bf16 %v1366_v36 }
  0x16   : > { %1188 = vmatmul.msk.f32.vlgmr.msra.gmra.mxu3 %vm284_vm3, %v281_v34  ;;  %1240 = vmatpush.msk.msra.mxu2 %vm303_vm0, %v826_v12  ;;  %v271_v46 = vsel %vm264_vm2, %v268_v25, %v270_v37  ;;  %v277_v47 = vsel %vm264_vm2, %v274_v27, %v276_v38  ;;  %v1314_v48 = vunpack.c.l.bf16 %v1498_v41  ;;  %v1315_v49 = vunpack.c.h.bf16 %v1498_v41 }
  0x17   : > { %1250 = vmatpush.msk.msra.mxu3 %vm303_vm0, %v905_v30  ;;  %1230 = vmatpush.msk.msra.mxu1 %vm303_vm0, %v749_v40  ;;  %v267_v44 = vsel %vm264_vm2, %v265_v39, %v266_v24  ;;  %v633_v50 = vrot.slane %v1334_v42, 3  ;;  %v634_v51 = vrot.slane %v1335_v45, 3  ;;  %v1338_v57 = vunpack.c.l.bf16 %v1367_v52  ;;  %v1353_v39 = vld [vmem:[%s1442_s23 + $0x10] sm:$0xff]  }
  0x18   : > { %1181 = vmatmul.msk.f32.vlgmr.msra.gmra.mxu0 %vm284_vm3, %v267_v44  ;;  %v1518_v54 = vrot.slane %v1314_v48, 2  ;;  %v530_v55 = vrot.slane %v1315_v49, 2  ;;  %v273_v59 = vsel %vm264_vm2, %v270_v37, %v272_v26  ;;  %v279_v60 = vsel %vm264_vm2, %v276_v38, %v278_v28  ;;  %v1368_v26 = vld [vmem:[%s1442_s23 + $0x88] sm:$0xff]  }
  0x19   : > { %1260 = vmatpush.msk.msra.mxu0 %vm303_vm0, %v254_v43  ;;  %v635_v56 = vsel %vm632_vm5, %v633_v50, %v634_v51  ;;  %v1274_v61 = vunpack.c.l.bf16 %v1273_v53  ;;  %v1528_v62 = vunpack.c.h.bf16 %v1273_v53  ;;  %v1318_v0 = vunpack.c.l.bf16 %v1524_v58 }
  0x1a   : > { %v531_v63 = vsel %vm528_vm6, %v1518_v54, %v530_v55  ;;  %v636_v1 = vrot.slane %v1338_v57, 3  ;;  %v1339_v7 = vunpack.c.h.bf16 %v1367_v52  ;;  %v1543_v12 = vunpack.c.l.bf16 %v1352_v4  ;;  %v1596_v57 = vld [vmem:[%s1442_s23 + $0x68] sm:$0xff]  }
  0x1b   : > { %v423_v2 = vrot.slane %v1274_v61, 1  ;;  %v424_v3 = vrot.slane %v1528_v62, 1  ;;  %v532_v5 = vrot.slane %v1318_v0, 2  ;;  %v1319_v24 = vunpack.c.h.bf16 %v1524_v58 }
  0x1c   : > { %v637_v6 = vsel %vm632_vm5, %v634_v51, %v636_v1  ;;  %v638_v25 = vrot.slane %v1339_v7, 3  ;;  %v426_v27 = vrot.slane %v1543_v12, 1  ;;  %v1342_v30 = vunpack.c.l.bf16 %v1368_v26  ;;  %v1369_v51 = vld [vmem:[%s1442_s23 + $0x90] sm:$0xff]  }
  0x1d   : > { %1183 = vmatmul.msk.f32.gmra.mxu1 %vm284_vm3, %v271_v46  ;;  %1186 = vmatmul.msk.f32.gmra.mxu2 %vm284_vm3, %v277_v47  ;;  %v425_v8 = vsel %vm264_vm2, %v423_v2, %v424_v3  ;;  %v533_v13 = vsel %vm528_vm6, %v530_v55, %v532_v5  ;;  %v534_v28 = vrot.slane %v1319_v24, 2  ;;  %v1562_v33 = vunpack.c.h.bf16 %v1352_v4 }
  0x1e   : > { %1189 = vmatmul.msk.f32.gmra.mxu3 %vm284_vm3, %v280_v29  ;;  %v639_v29 = vsel %vm632_vm5, %v636_v1, %v638_v25  ;;  %v1560_v32 = vsel %vm264_vm2, %v424_v3, %v426_v27  ;;  %v1322_v36 = vunpack.c.l.bf16 %v1557_v31  ;;  %v640_v37 = vrot.slane %v1342_v30, 3  ;;  %v1354_v3 = vld [vmem:[%s1442_s23 + $0x18] sm:$0xff]  }
  0x1f   : > { %v535_v34 = vsel %vm528_vm6, %v532_v5, %v534_v28  ;;  %v428_v38 = vrot.slane %v1562_v33, 1  ;;  %v1343_v43 = vunpack.c.h.bf16 %v1368_v26  ;;  %v1580_v45 = vunpack.c.l.bf16 %v1353_v39 }
  0x20   : > { %1221 = vmatmul.msk.f32.vlgmr.msrb.gmra.mxu0 %vm284_vm3, %v635_v56  ;;  %v536_v40 = vrot.slane %v1322_v36, 2  ;;  %v641_v42 = vsel %vm632_vm5, %v638_v25, %v640_v37  ;;  %v1323_v47 = vunpack.c.h.bf16 %v1557_v31  ;;  %v1346_v56 = vunpack.c.l.bf16 %v1369_v51 }
  0x21   : > { %v1578_v44 = vsel %vm264_vm2, %v426_v27, %v428_v38  ;;  %v642_v50 = vrot.slane %v1343_v43, 3  ;;  %v430_v52 = vrot.slane %v1580_v45, 1  ;;  %v1327_v25 = vunpack.c.h.bf16 %v1596_v57  ;;  %v1370_v27 = vld [vmem:[%s1442_s23 + $0x98] sm:$0xff]  }
  0x22   : > { %v537_v46 = vsel %vm528_vm6, %v534_v28, %v536_v40  ;;  %v538_v53 = vrot.slane %v1323_v47, 2  ;;  %v644_v1 = vrot.slane %v1346_v56, 3  ;;  %v726_v28 = vrot.slane %v1314_v48, 3 }
  0x23   : > { %v643_v55 = vsel %vm632_vm5, %v640_v37, %v642_v50  ;;  %v1645_v41 = vunpack.c.h.bf16 %v1354_v3  ;;  %v896_v11 = vrot.slane %v1306_v21, 2  ;;  %v898_v21 = vrot.slane %v1307_v22, 2 }
  0x24   : > { %v645_v5 = vsel %vm632_vm5, %v642_v50, %v644_v1  ;;  %v900_v22 = vrot.slane %v1310_v23, 2  ;;  %v739_v23 = vrot.slane %v1327_v25, 3  ;;  %vm1103_vm7 = vcmask 125952  }
  0x25   : > { %1184 = vmatmul.msk.f32.gmra.mxu1 %vm284_vm3, %v273_v59  ;;  %1187 = vmatmul.msk.f32.gmra.mxu2 %vm284_vm3, %v279_v60  ;;  %v1599_v59 = vsel %vm264_vm2, %v428_v38, %v430_v52  ;;  %v1601_v60 = vunpack.c.h.bf16 %v1353_v39  ;;  %v1350_v38 = vunpack.c.l.bf16 %v1370_v27  ;;  %v436_v50 = vrot.slane %v1645_v41, 1 }
  0x26   : > { %1211 = vmatmul.msk.f32.vlgmr.msrb.gmra.mxu3 %vm284_vm3, %v531_v63  ;;  %v1326_v63 = vunpack.c.l.bf16 %v1596_v57  ;;  %v996_v57 = vrot.slane %v1294_v35, 2  ;;  %vm1113_vm8 = vsmask.f32 3328 }
  0x27   : > { %v432_v2 = vrot.slane %v1601_v60, 1  ;;  %v648_v43 = vrot.slane %v1350_v38, 3  ;;  %v984_v38 = vrot.slane %v1580_v45, 2  ;;  %vm1114_vm9 = vmand %vm1103_vm7, %vm1113_vm8 }
  0x28   : > { %1222 = vmatmul.msk.f32.gmra.mxu0 %vm284_vm3, %v637_v6  ;;  %v540_v4 = vrot.slane %v1326_v63, 2  ;;  %v1347_v6 = vunpack.c.h.bf16 %v1369_v51  ;;  %v1659_v51 = vld [vmem:[%s1442_s23 + $0x20] sm:$0xff]   ;;  %v737_v18 = vrot.slane %v1326_v63, 3  ;;  %v901_v63 = vsel %vm528_vm6, %v898_v21, %v900_v22 }
  0x29   : > { %v1617_v7 = vsel %vm264_vm2, %v430_v52, %v432_v2 }
  0x2a   : > { %v646_v26 = vrot.slane %v1347_v6, 3 }
  0x2c   : > { %v647_v37 = vsel %vm632_vm5, %v644_v1, %v646_v26  ;;  %v1669_v1 = vunpack.c.l.bf16 %v1659_v51 }
  0x2d   : > { %1191 = vmatmul.msk.f32.vlgmr.msrb.gmra.mxu1 %vm284_vm3, %v1274_v61  ;;  %1201 = vmatmul.msk.f32.vlgmr.msrb.gmra.mxu2 %vm284_vm3, %v425_v8  ;;  %v539_v61 = vsel %vm528_vm6, %v536_v40, %v538_v53  ;;  %v1619_v8 = vunpack.c.l.bf16 %v1354_v3  ;;  %v1640_v40 = vld [vmem:[%s1442_s23 + $0x70] sm:$0xff]  }
  0x2e   : > { %1212 = vmatmul.msk.f32.gmra.mxu3 %vm284_vm3, %v533_v13  ;;  %v541_v13 = vsel %vm528_vm6, %v538_v53, %v540_v4  ;;  %v649_v53 = vsel %vm632_vm5, %v646_v26, %v648_v43 }
  0x2f   : > { %v434_v30 = vrot.slane %v1619_v8, 1 }
  0x30   : > { %1223 = vmatmul.msk.f32.gmra.mxu0 %vm284_vm3, %v639_v29  ;;  %v727_v29 = vrot.slane %v1315_v49, 3 }
  0x31   : > { %v1643_v48 = vsel %vm264_vm2, %v432_v2, %v434_v30  ;;  %v1331_v2 = vunpack.c.h.bf16 %v1640_v40 }
  0x32   : > { %v728_v39 = vsel %vm632_vm5, %v726_v28, %v727_v29  ;;  %v980_v28 = vrot.slane %v1543_v12, 2 }
  0x33   : > { %v546_v6 = vrot.slane %v1331_v2, 2 }
  0x35   : > { %1192 = vmatmul.msk.f32.gmra.mxu1 %vm284_vm3, %v1528_v62  ;;  %1202 = vmatmul.msk.f32.gmra.mxu2 %vm284_vm3, %v1560_v32 }
  0x36   : > { %1213 = vmatmul.msk.f32.gmra.mxu3 %vm284_vm3, %v535_v34  ;;  %v542_v34 = vrot.slane %v1327_v25, 2 }
  0x38   : > { %1224 = vmatmul.msk.f32.gmra.mxu0 %vm284_vm3, %v641_v42  ;;  %v543_v49 = vsel %vm528_vm6, %v540_v4, %v542_v34  ;;  %v1330_v42 = vunpack.c.l.bf16 %v1640_v40  ;;  %v731_v4 = vrot.slane %v1319_v24, 3  ;;  %v979_v24 = vrot.slane %v1528_v62, 2 }
  0x3a   : > { %v544_v52 = vrot.slane %v1330_v42, 2  ;;  %v741_v25 = vrot.slane %v1330_v42, 3 }
  0x3c   : > { %v547_v58 = vsel %vm528_vm6, %v544_v52, %v546_v6  ;;  %v742_v9 = vsel %vm632_vm5, %v739_v23, %v741_v25 }
  0x3d   : > { %1193 = vmatmul.msk.f32.gmra.mxu1 %vm284_vm3, %v1543_v12  ;;  %1203 = vmatmul.msk.f32.gmra.mxu2 %vm284_vm3, %v1578_v44  ;;  %v982_v12 = vrot.slane %v1562_v33, 2 }
  0x3e   : > { %1214 = vmatmul.msk.f32.gmra.mxu3 %vm284_vm3, %v537_v46  ;;  %v729_v46 = vrot.slane %v1318_v0, 3  ;;  %v545_v0 = vsel %vm528_vm6, %v542_v34, %v544_v52  ;;  %v981_v34 = vsel %vm528_vm6, %v979_v24, %v980_v28  ;;  %v992_v52 = vrot.slane %v1669_v1, 2 }
  0x3f   : > { %v985_v10 = vsel %vm528_vm6, %v982_v12, %v984_v38 }
  0x40   : > { %1225 = vmatmul.msk.f32.gmra.mxu0 %vm284_vm3, %v643_v55  ;;  %v1351_v55 = vunpack.c.h.bf16 %v1370_v27  ;;  %v730_v56 = vsel %vm632_vm5, %v727_v29, %v729_v46  ;;  %v732_v26 = vsel %vm632_vm5, %v729_v46, %v731_v4  ;;  %v887_v29 = vrot.slane %v1295_v14, 2 }
  0x41   : > { %v890_v14 = vrot.slane %v1299_v20, 2 }
  0x42   : > { %v650_v3 = vrot.slane %v1351_v55, 3  ;;  %v1291_v55 = vunpack.c.h.bf16 %v1659_v51 }
  0x45   : > { %1194 = vmatmul.msk.f32.gmra.mxu1 %vm284_vm3, %v1562_v33  ;;  %1204 = vmatmul.msk.f32.gmra.mxu2 %vm284_vm3, %v1599_v59  ;;  %v892_v33 = vrot.slane %v1302_v16, 2 }
  0x46   : > { %1215 = vmatmul.msk.f32.gmra.mxu3 %vm284_vm3, %v539_v61  ;;  %v1666_v61 = vsel %vm264_vm2, %v434_v30, %v436_v50  ;;  %v888_v30 = vrot.slane %v1298_v15, 2  ;;  %v983_v15 = vsel %vm528_vm6, %v980_v28, %v982_v12 }
  0x47   : > { %v893_v20 = vsel %vm528_vm6, %v890_v14, %v892_v33 }
  0x48   : > { %1226 = vmatmul.msk.f32.gmra.mxu0 %vm284_vm3, %v645_v5  ;;  %v1681_v5 = vrot.slane %v1669_v1, 1  ;;  %v889_v62 = vsel %vm528_vm6, %v887_v29, %v888_v30 }
  0x4a   : > { %v1690_v27 = vsel %vm264_vm2, %v436_v50, %v1681_v5 }
  0x4d   : > { %1195 = vmatmul.msk.f32.gmra.mxu1 %vm284_vm3, %v1580_v45  ;;  %1205 = vmatmul.msk.f32.gmra.mxu2 %vm284_vm3, %v1617_v7 }
  0x4e   : > { %1216 = vmatmul.msk.f32.gmra.mxu3 %vm284_vm3, %v541_v13  ;;  %v651_v13 = vsel %vm632_vm5, %v648_v43, %v650_v3  ;;  %v990_v43 = vrot.slane %v1645_v41, 2 }
  0x50   : > { %1227 = vmatmul.msk.f32.gmra.mxu0 %vm284_vm3, %v647_v37  ;;  %v891_v37 = vsel %vm528_vm6, %v888_v30, %v890_v14 }
  0x55   : > { %1196 = vmatmul.msk.f32.gmra.mxu1 %vm284_vm3, %v1601_v60  ;;  %1206 = vmatmul.msk.f32.gmra.mxu2 %vm284_vm3, %v1643_v48 }
  0x56   : > { %1217 = vmatmul.msk.f32.gmra.mxu3 %vm284_vm3, %v543_v49  ;;  %v986_v49 = vrot.slane %v1601_v60, 2 }
  0x58   : > { %1228 = vmatmul.msk.f32.gmra.mxu0 %vm284_vm3, %v649_v53  ;;  %v987_v16 = vsel %vm528_vm6, %v984_v38, %v986_v49 }
  0x5d   : > { %1197 = vmatmul.msk.f32.gmra.mxu1 %vm284_vm3, %v1619_v8  ;;  %1207 = vmatmul.msk.f32.gmra.mxu2 %vm284_vm3, %v1666_v61 }
  0x5e   : > { %1218 = vmatmul.msk.f32.gmra.mxu3 %vm284_vm3, %v545_v0  ;;  %v994_v0 = vrot.slane %v1291_v55, 2 }
  0x60   : > { %1229 = vmatmul.msk.f32.gmra.mxu0 %vm284_vm3, %v651_v13  ;;  %v997_v28 = vsel %vm528_vm6, %v994_v0, %v996_v57 }
  0x65   : > { %1198 = vmatmul.msk.f32.gmra.mxu1 %vm284_vm3, %v1645_v41  ;;  %1208 = vmatmul.msk.f32.gmra.mxu2 %vm284_vm3, %v1690_v27  ;;  %v899_v41 = vsel %vm528_vm6, %v896_v11, %v898_v21 }
  0x66   : > { %1219 = vmatmul.msk.f32.gmra.mxu3 %vm284_vm3, %v547_v58  ;;  %v824_v58 = vrot.slane %v1291_v55, 1 }
  0x68   : > { %1261 = vmatmul.msk.f32.vlgmr.msra.gmra.mxu0 %vm284_vm3, %v981_v34  ;;  %v825_v35 = vsel %vm264_vm2, %v1681_v5, %v824_v58 }
  0x6d   : > { %1199 = vmatmul.msk.f32.gmra.mxu1 %vm284_vm3, %v1669_v1  ;;  %1209 = vmatmul.msk.f32.gmra.mxu2 %vm284_vm3, %v1681_v5  ;;  %v1311_v1 = vunpack.c.h.bf16 %v1463_v19 }
  0x6e   : > { %1251 = vmatmul.msk.f32.vlgmr.msra.gmra.mxu3 %vm284_vm3, %v889_v62  ;;  %v743_v62 = vrot.slane %v1331_v2, 3 }
  0x6f   : > { %v902_v51 = vrot.slane %v1311_v1, 2 }
  0x70   : > { %1262 = vmatmul.msk.f32.gmra.mxu0 %vm284_vm3, %v983_v15  ;;  %v744_v38 = vsel %vm632_vm5, %v741_v25, %v743_v62 }
  0x71   : > { %v904_v42 = vsel %vm528_vm6, %v902_v51, %v1518_v54 }
  0x75   : > { %1231 = vmatmul.msk.f32.vlgmr.msra.gmra.mxu1 %vm284_vm3, %v728_v39  ;;  %1241 = vmatmul.msk.f32.vlgmr.msra.gmra.mxu2 %vm284_vm3, %v1560_v32  ;;  %v894_v32 = vrot.slane %v1303_v17, 2  ;;  %v988_v39 = vrot.slane %v1619_v8, 2 }
  0x76   : > { %1252 = vmatmul.msk.f32.gmra.mxu3 %vm284_vm3, %v891_v37 }
  0x77   : > { %v895_v45 = vsel %vm528_vm6, %v892_v33, %v894_v32  ;;  %v989_v17 = vsel %vm528_vm6, %v986_v49, %v988_v39  ;;  %v897_v8 = vsel %vm528_vm6, %v894_v32, %v896_v11 }
  0x78   : > { %1263 = vmatmul.msk.f32.gmra.mxu0 %vm284_vm3, %v985_v10 }
  0x7d   : > { %1232 = vmatmul.msk.f32.gmra.mxu1 %vm284_vm3, %v730_v56  ;;  %1242 = vmatmul.msk.f32.gmra.mxu2 %vm284_vm3, %v1578_v44  ;;  %v733_v44 = vrot.slane %v1322_v36, 3  ;;  %v735_v36 = vrot.slane %v1323_v47, 3  ;;  %v993_v47 = vsel %vm528_vm6, %v990_v43, %v992_v52 }
  0x7e   : > { %1253 = vmatmul.msk.f32.gmra.mxu3 %vm284_vm3, %v893_v20 }
  0x7f   : > { %v734_v60 = vsel %vm632_vm5, %v731_v4, %v733_v44  ;;  %v736_v50 = vsel %vm632_vm5, %v733_v44, %v735_v36  ;;  %v995_v4 = vsel %vm528_vm6, %v992_v52, %v994_v0 }
  0x80   : > { %1264 = vmatmul.msk.f32.gmra.mxu0 %vm284_vm3, %v987_v16 }
  0x85   : > { %1233 = vmatmul.msk.f32.gmra.mxu1 %vm284_vm3, %v732_v26  ;;  %1243 = vmatmul.msk.f32.gmra.mxu2 %vm284_vm3, %v1599_v59  ;;  %v991_v59 = vsel %vm528_vm6, %v988_v39, %v990_v43  ;;  %v740_v26 = vsel %vm632_vm5, %v737_v18, %v739_v23 }
  0x86   : > { %1254 = vmatmul.msk.f32.gmra.mxu3 %vm284_vm3, %v895_v45 }
  0x88   : > { %1265 = vmatmul.msk.f32.gmra.mxu0 %vm284_vm3, %v989_v17 }
  0x8d   : > { %1234 = vmatmul.msk.f32.gmra.mxu1 %vm284_vm3, %v734_v60  ;;  %1244 = vmatmul.msk.f32.gmra.mxu2 %vm284_vm3, %v1617_v7 }
  0x8e   : > { %1255 = vmatmul.msk.f32.gmra.mxu3 %vm284_vm3, %v897_v8 }
  0x90   : > { %1266 = vmatmul.msk.f32.gmra.mxu0 %vm284_vm3, %v991_v59 }
  0x92   : > { %v326_v46 = vpop.f32.mrf.mxu1 }
  0x95   : > { %1235 = vmatmul.msk.f32.gmra.mxu1 %vm284_vm3, %v736_v50  ;;  %1245 = vmatmul.msk.f32.gmra.mxu2 %vm284_vm3, %v1643_v48  ;;  %v323_v31 = vpop.f32.mrf.mxu0  ;;  %v738_v48 = vsel %vm632_vm5, %v735_v36, %v737_v18 }
  0x96   : > { %1256 = vmatmul.msk.f32.gmra.mxu3 %vm284_vm3, %v899_v41 }
  0x98   : > { %v1775_v7 = vpop.f32.mrf.mxu2  ;;  %1267 = vmatmul.msk.f32.gmra.mxu0 %vm284_vm3, %v993_v47 }
  0x99   : > { %v1777_v53 = vpop.f32.mrf.mxu3 }
  0x9a   : > { %v329_v56 = vpop.f32.mrf.mxu1 }
  0x9d   : > { %1236 = vmatmul.msk.f32.gmra.mxu1 %vm284_vm3, %v738_v48  ;;  %1246 = vmatmul.msk.f32.gmra.mxu2 %vm284_vm3, %v1666_v61  ;;  %v690_v3 = vpop.f32.mrf.mxu0  ;;  %v903_v61 = vsel %vm528_vm6, %v900_v22, %v902_v51 }
  0x9e   : > { %1257 = vmatmul.msk.f32.gmra.mxu3 %vm284_vm3, %v901_v63 }
  0xa0   : > { %v1791_v6 = vpop.f32.mrf.mxu2  ;;  %1268 = vmatmul.msk.f32.gmra.mxu0 %vm284_vm3, %v995_v4 }
  0xa1   : > { %v1793_v13 = vpop.f32.mrf.mxu3 }
  0xa2   : > { %v332_v19 = vpop.f32.mrf.mxu1 }
  0xa5   : > { %1237 = vmatmul.msk.f32.gmra.mxu1 %vm284_vm3, %v740_v26  ;;  %1247 = vmatmul.msk.f32.gmra.mxu2 %vm284_vm3, %v1690_v27  ;;  %v693_v24 = vpop.f32.mrf.mxu0 }
  0xa6   : > { %1258 = vmatmul.msk.f32.gmra.mxu3 %vm284_vm3, %v903_v61 }
  0xa8   : > { %v341_v29 = vpop.f32.mrf.mxu2  ;;  %1269 = vmatmul.msk.f32.gmra.mxu0 %vm284_vm3, %v997_v28 }
  0xa9   : > { %v586_v30 = vpop.f32.mrf.mxu3 }
  0xaa   : > { %v396_v34 = vpop.f32.mrf.mxu1 }
  0xab   : > { %v397_v27 = vadd.f32 %v396_v34, %v323_v31 }
  0xad   : > { %1238 = vmatmul.msk.f32.gmra.mxu1 %vm284_vm3, %v742_v9  ;;  %1248 = vmatmul.msk.f32.gmra.mxu2 %vm284_vm3, %v825_v35  ;;  %v696_v12 = vpop.f32.mrf.mxu0 }
  0xae   : > { %1259 = vmatmul.msk.f32.gmra.mxu3 %vm284_vm3, %v904_v42 }
  0xb0   : > { %v482_v14 = vpop.f32.mrf.mxu2 }
  0xb1   : > { %v509_v15 = vadd.f32 %v482_v14, %v397_v27  ;;  %v589_v37 = vpop.f32.mrf.mxu3 }
  0xb2   : > { %v399_v5 = vpop.f32.mrf.mxu1 }
  0xb3   : > { %v400_v33 = vadd.f32 %v399_v5, %v326_v46  ;;  %v613_v10 = vadd.f32 %v586_v30, %v509_v15 }
  0xb5   : > { %v1819_v20 = vadd.f32 %v690_v3, %v613_v10  ;;  %1239 = vmatmul.msk.f32.gmra.mxu1 %vm284_vm3, %v744_v38  ;;  %1249 = vmatmul.msk.f32.gmra.mxu2 %vm284_vm3, %v824_v58  ;;  %v699_v54 = vpop.f32.mrf.mxu0 }
  0xb8   : > { %v485_v40 = vpop.f32.mrf.mxu2 }
  0xb9   : > { %v510_v2 = vadd.f32 %v485_v40, %v400_v33  ;;  %v592_v49 = vpop.f32.mrf.mxu3 }
  0xba   : > { %v402_v32 = vpop.f32.mrf.mxu1 }
  0xbb   : > { %v403_v16 = vadd.f32 %v402_v32, %v329_v56  ;;  %v614_v45 = vadd.f32 %v589_v37, %v510_v2 }
  0xbd   : > { %v1823_v39 = vadd.f32 %v693_v24, %v614_v45  ;;  %v702_v44 = vpop.f32.mrf.mxu0 }
  0xc0   : > { %v488_v11 = vpop.f32.mrf.mxu2 }
  0xc1   : > { %v511_v17 = vadd.f32 %v488_v11, %v403_v16  ;;  %v595_v60 = vpop.f32.mrf.mxu3 }
  0xc2   : > { %v405_v8 = vpop.f32.mrf.mxu1 }
  0xc3   : > { %v406_v43 = vadd.f32 %v405_v8, %v332_v19  ;;  %v615_v36 = vadd.f32 %v592_v49, %v511_v17 }
  0xc5   : > { %v1825_v21 = vadd.f32 %v696_v12, %v615_v36  ;;  %v705_v59 = vpop.f32.mrf.mxu0 }
  0xc8   : > { %v491_v46 = vpop.f32.mrf.mxu2 }
  0xc9   : > { %v512_v50 = vadd.f32 %v491_v46, %v406_v43  ;;  %v598_v41 = vpop.f32.mrf.mxu3 }
  0xca   : > { %v408_v52 = vpop.f32.mrf.mxu1 }
  0xcb   : > { %v409_v18 = vadd.f32 %v408_v52, %v1775_v7  ;;  %v616_v22 = vadd.f32 %v595_v60, %v512_v50 }
  0xcd   : > { %v1828_v31 = vadd.f32 %v699_v54, %v616_v22  ;;  %v708_v47 = vpop.f32.mrf.mxu0 }
  0xd0   : > { %v494_v55 = vpop.f32.mrf.mxu2 }
  0xd1   : > { %v513_v56 = vadd.f32 %v494_v55, %v409_v18  ;;  %v601_v48 = vpop.f32.mrf.mxu3 }
  0xd2   : > { %v411_v63 = vpop.f32.mrf.mxu1 }
  0xd3   : > { %v412_v1 = vadd.f32 %v411_v63, %v1791_v6  ;;  %v617_v0 = vadd.f32 %v598_v41, %v513_v56 }
  0xd5   : > { %v1831_v23 = vadd.f32 %v702_v44, %v617_v0  ;;  %v711_v51 = vpop.f32.mrf.mxu0 }
  0xd8   : > { %v497_v3 = vpop.f32.mrf.mxu2 }
  0xd9   : > { %v514_v4 = vadd.f32 %v497_v3, %v412_v1  ;;  %v604_v19 = vpop.f32.mrf.mxu3 }
  0xda   : > { %v414_v26 = vpop.f32.mrf.mxu1 }
  0xdb   : > { %v415_v61 = vadd.f32 %v414_v26, %v341_v29  ;;  %v618_v7 = vadd.f32 %v601_v48, %v514_v4 }
  0xdd   : > { %v1833_v57 = vadd.f32 %v705_v59, %v618_v7  ;;  %v714_v58 = vpop.f32.mrf.mxu0 }
  0xe0   : > { %v500_v25 = vpop.f32.mrf.mxu2 }
  0xe1   : > { %v515_v24 = vadd.f32 %v500_v25, %v415_v61  ;;  %v607_v28 = vpop.f32.mrf.mxu3 }
  0xe2   : > { %v417_v30 = vpop.f32.mrf.mxu1 }
  0xe3   : > { %v619_v34 = vadd.f32 %v604_v19, %v515_v24  ;;  %v418_v6 = vadd.f32 %v417_v30, %v1777_v53 }
  0xe5   : > { %v1835_v9 = vadd.f32 %v708_v47, %v619_v34  ;;  %v1036_v12 = vpop.f32.mrf.mxu0 }
  0xe8   : > { %v503_v35 = vpop.f32.mrf.mxu2 }
  0xe9   : > { %v516_v27 = vadd.f32 %v503_v35, %v418_v6  ;;  %v610_v42 = vpop.f32.mrf.mxu3 }
  0xea   : > { %v420_v62 = vpop.f32.mrf.mxu1 }
  0xeb   : > { %v620_v14 = vadd.f32 %v607_v28, %v516_v27  ;;  %v421_v15 = vadd.f32 %v420_v62, %v1793_v13  ;;  %v1847_v13 = vld [vmem:[%s1896_s2] ss:$0 sm:$0xff] }
  0xed   : > { %v1838_v29 = vadd.f32 %v711_v51, %v620_v14  ;;  %v1039_v54 = vpop.f32.mrf.mxu0 }
  0xf0   : > { %v506_v37 = vpop.f32.mrf.mxu2 }
  0xf1   : > { %v517_v5 = vadd.f32 %v506_v37, %v421_v15  ;;  %v943_v38 = vpop.f32.mrf.mxu3 }
  0xf2   : > { %v787_v33 = vpop.f32.mrf.mxu1 }
  0xf3   : > { %v621_v10 = vadd.f32 %v610_v42, %v517_v5  ;;  %v814_v53 = vadd.f32 %v787_v33, %v1819_v20 }
  0xf5   : > { %v1841_v40 = vadd.f32 %v714_v58, %v621_v10  ;;  %v1042_v11 = vpop.f32.mrf.mxu0 }
  0xf8   : > { %v850_v2 = vpop.f32.mrf.mxu2 }
  0xf9   : > { %v877_v49 = vadd.f32 %v850_v2, %v814_v53  ;;  %v946_v32 = vpop.f32.mrf.mxu3 }
  0xfa   : > { %v790_v16 = vpop.f32.mrf.mxu1 }
  0xfb   : > { %v970_v45 = vadd.f32 %v943_v38, %v877_v49  ;;  %v815_v17 = vadd.f32 %v790_v16, %v1823_v39 }
  0xfd   : > { %v1063_v44 = vadd.f32 %v1036_v12, %v970_v45  ;;  %v1045_v22 = vpop.f32.mrf.mxu0 }
  0xff   : > { %v1076_v60 = vadd.f32 %v1847_v13, %v1063_v44 }
 0x100   : > { %v853_v8 = vpop.f32.mrf.mxu2 }
 0x101   : > { %v1085_v43 = vmax.f32 %v1076_v60, 0.0  ;;  %v878_v20 = vadd.f32 %v853_v8, %v815_v17  ;;  %v949_v36 = vpop.f32.mrf.mxu3 }
 0x102   : > { %v793_v59 = vpop.f32.mrf.mxu1 }
 0x103   : > { %v1094_v46 = vpack.c.bf16 %v1085_v43, %v1085_v43  ;;  %v971_v50 = vadd.f32 %v946_v32, %v878_v20  ;;  %v816_v41 = vadd.f32 %v793_v59, %v1825_v21 }
 0x105   : > { %1104 = vst.msk [vmem:[%s1855_s4] sm:$0xf] %vm1103_vm7, %v1094_v46  ;;  %v1064_v39 = vadd.f32 %v1039_v54, %v971_v50  ;;  %v1048_v7 = vpop.f32.mrf.mxu0 }
 0x107   : > { %v1077_v52 = vadd.f32 %v1847_v13, %v1064_v39 }
 0x108   : > { %v856_v18 = vpop.f32.mrf.mxu2 }
 0x109   : > { %v1086_v47 = vmax.f32 %v1077_v52, 0.0  ;;  %v879_v55 = vadd.f32 %v856_v18, %v816_v41  ;;  %v952_v56 = vpop.f32.mrf.mxu3 }
 0x10a   : > { %v796_v48 = vpop.f32.mrf.mxu1 }
 0x10b   : > { %v1095_v63 = vpack.c.bf16 %v1086_v47, %v1086_v47  ;;  %v972_v1 = vadd.f32 %v949_v36, %v879_v55  ;;  %v817_v51 = vadd.f32 %v796_v48, %v1828_v31 }
 0x10d   : > { %1105 = vst.msk [vmem:[%s1855_s4 + $0x4] sm:$0xf] %vm1103_vm7, %v1095_v63  ;;  %v1065_v0 = vadd.f32 %v1042_v11, %v972_v1  ;;  %v1051_v12 = vpop.f32.mrf.mxu0 }
 0x10f   : > { %v1078_v3 = vadd.f32 %v1847_v13, %v1065_v0 }
 0x110   : > { %v859_v4 = vpop.f32.mrf.mxu2 }
 0x111   : > { %v1087_v21 = vmax.f32 %v1078_v3, 0.0  ;;  %v880_v19 = vadd.f32 %v859_v4, %v817_v51  ;;  %v955_v26 = vpop.f32.mrf.mxu3 }
 0x112   : > { %v799_v61 = vpop.f32.mrf.mxu1 }
 0x113   : > { %v1096_v25 = vpack.c.bf16 %v1087_v21, %v1087_v21  ;;  %v973_v58 = vadd.f32 %v952_v56, %v880_v19  ;;  %v818_v28 = vadd.f32 %v799_v61, %v1831_v23 }
 0x115   : > { %1106 = vst.msk [vmem:[%s1855_s4 + $0x8] sm:$0xf] %vm1103_vm7, %v1096_v25  ;;  %v1066_v24 = vadd.f32 %v1045_v22, %v973_v58  ;;  %v1054_v49 = vpop.f32.mrf.mxu0 }
 0x117   : > { %v1079_v30 = vadd.f32 %v1847_v13, %v1066_v24 }
 0x118   : > { %v862_v34 = vpop.f32.mrf.mxu2 }
 0x119   : > { %v1088_v31 = vmax.f32 %v1079_v30, 0.0  ;;  %v881_v6 = vadd.f32 %v862_v34, %v818_v28  ;;  %v958_v27 = vpop.f32.mrf.mxu3 }
 0x11a   : > { %v802_v35 = vpop.f32.mrf.mxu1 }
 0x11b   : > { %v1097_v42 = vpack.c.bf16 %v1088_v31, %v1088_v31  ;;  %v974_v62 = vadd.f32 %v955_v26, %v881_v6  ;;  %v819_v15 = vadd.f32 %v802_v35, %v1833_v57 }
 0x11d   : > { %1107 = vst.msk [vmem:[%s1855_s4 + $0xc] sm:$0xf] %vm1103_vm7, %v1097_v42  ;;  %v1067_v14 = vadd.f32 %v1048_v7, %v974_v62  ;;  %v1057_v46 = vpop.f32.mrf.mxu0 }
 0x11f   : > { %v1080_v37 = vadd.f32 %v1847_v13, %v1067_v14 }
 0x120   : > { %v865_v5 = vpop.f32.mrf.mxu2 }
 0x121   : > { %v1089_v23 = vmax.f32 %v1080_v37, 0.0  ;;  %v882_v38 = vadd.f32 %v865_v5, %v819_v15  ;;  %v961_v53 = vpop.f32.mrf.mxu3 }
 0x122   : > { %v805_v33 = vpop.f32.mrf.mxu1 }
 0x123   : > { %v1098_v10 = vpack.c.bf16 %v1089_v23, %v1089_v23  ;;  %v975_v54 = vadd.f32 %v958_v27, %v882_v38  ;;  %v820_v32 = vadd.f32 %v805_v33, %v1835_v9 }
 0x125   : > { %1108 = vst.msk [vmem:[%s1855_s4 + $0x10] sm:$0xf] %vm1103_vm7, %v1098_v10  ;;  %v1068_v2 = vadd.f32 %v1051_v12, %v975_v54  ;;  %v1060_v63 = vpop.f32.mrf.mxu0 }
 0x127   : > { %v1081_v16 = vadd.f32 %v1847_v13, %v1068_v2 }
 0x128   : > { %v868_v45 = vpop.f32.mrf.mxu2 }
 0x129   : > { %v1090_v57 = vmax.f32 %v1081_v16, 0.0  ;;  %v883_v44 = vadd.f32 %v868_v45, %v820_v32  ;;  %v964_v43 = vpop.f32.mrf.mxu3 }
 0x12a   : > { %v808_v11 = vpop.f32.mrf.mxu1 }
 0x12b   : > { %v1099_v17 = vpack.c.bf16 %v1090_v57, %v1090_v57  ;;  %v976_v60 = vadd.f32 %v961_v53, %v883_v44  ;;  %v821_v20 = vadd.f32 %v808_v11, %v1838_v29 }
 0x12d   : > { %1109 = vst.msk [vmem:[%s1855_s4 + $0x14] sm:$0xf] %vm1103_vm7, %v1099_v17  ;;  %v1069_v8 = vadd.f32 %v1054_v49, %v976_v60 }
 0x12f   : > { %v1082_v36 = vadd.f32 %v1847_v13, %v1069_v8 }
 0x130   : > { %v871_v59 = vpop.f32.mrf.mxu2 }
 0x131   : > { %v1091_v9 = vmax.f32 %v1082_v36, 0.0  ;;  %v884_v50 = vadd.f32 %v871_v59, %v821_v20  ;;  %v967_v29 = vpop.f32.mrf.mxu3 }
 0x132   : > { %v811_v52 = vpop.f32.mrf.mxu1 }
 0x133   : > { %v1100_v39 = vpack.c.bf16 %v1091_v9, %v1091_v9  ;;  %v977_v41 = vadd.f32 %v964_v43, %v884_v50  ;;  %v822_v22 = vadd.f32 %v811_v52, %v1841_v40  ;;  %v1115_v40 = vld [vmem:[%s1855_s4 + $0x20] sm:$0xf] }
 0x135   : > { %1110 = vst.msk [vmem:[%s1855_s4 + $0x18] sm:$0xf] %vm1103_vm7, %v1100_v39  ;;  %v1070_v18 = vadd.f32 %v1057_v46, %v977_v41 }
 0x137   : > { %v1083_v47 = vadd.f32 %v1847_v13, %v1070_v18 }
 0x138   : > { %v874_v55 = vpop.f32.mrf.mxu2 }
 0x139   : > { %v1092_v56 = vmax.f32 %v1083_v47, 0.0  ;;  %v885_v48 = vadd.f32 %v874_v55, %v822_v22 }
 0x13b   : > { %v1101_v1 = vpack.c.bf16 %v1092_v56, %v1092_v56  ;;  %v978_v0 = vadd.f32 %v967_v29, %v885_v48 }
 0x13d   : > { %1111 = vst.msk [vmem:[%s1855_s4 + $0x1c] sm:$0xf] %vm1103_vm7, %v1101_v1  ;;  %v1071_v51 = vadd.f32 %v1060_v63, %v978_v0 }
 0x13f   : > { %v1084_v3 = vadd.f32 %v1847_v13, %v1071_v51 }
 0x141   : > { %v1093_v4 = vmax.f32 %v1084_v3, 0.0 }
 0x143   : > { %v1102_v21 = vpack.c.bf16 %v1093_v4, %v1093_v4 }
 0x145   : > { %v1116_v19 = vsel %vm1114_vm9, %v1102_v21, %v1115_v40 }
 0x146   : > { %1117 = vst [vmem:[%s1855_s4 + $0x20] sm:$0xf] %v1116_v19 }
 0x147 PF: > { %s13_s12 = sadd.s32 1, %s1391_s12  }
 0x148   : > { %p10_p4 = scmp.ge.s32.totalorder %s13_s12, 4  }
 0x14a   :  { %12 = sbr.rel (!%p10_p4) target bundleno = 1 (0x1), region = 62 }

// kernel: combined_model_forward.5
= control target key start
LH: loop header
LB: loop body
LE: loop exit
PB: predicated region body
PF: predicated region fallthrough
CT: control target
= control target key end

     0   :  { %s768_s12 = smov 0   ;;  %s938_s0 = inlined_call_operand.vmem [shape: bf16[2,100,16], index: 0, kind: input, shape index: {}]   ;;  %s939_s1 = inlined_call_operand.vmem [shape: f32[144,32], index: 1, kind: input, shape index: {}]   ;;  %s940_s2 = inlined_call_operand.vmem [shape: f32[1,32], index: 2, kind: input, shape index: {}]   ;;  %s941_s3 = inlined_call_operand.vmem [shape: bf16[2,19,32], index: 3, kind: output, shape index: {}]  }
   0x1 LB: > { %s660_s13 = sadd.s32 4294967295, %s746_s12   ;;  %p664_p0 = scmp.ge.s32.totalorder %s746_s12, 1  ;;  %s746_s12 = sphi %s768_s12, %s13_s12  }
   0x2   : > { %p137_p1 = scmp.lt.s32.totalorder %s746_s12, 3 }
   0x4   : > { %p138_p2 = pnand %p664_p0, %p137_p1 }
   0x5   : > { %p161_p3 = scmp.lt.s32.totalorder (!%p138_p2), %s660_s13, 1 }
   0x6   : > { %141 = sbr.rel (%p138_p2) target bundleno = 214 (0xd6), region = 32 }
   0xb   : > { %v198_v0 = vld [vmem:[%s939_s1 + $0x18] sm:$0xff]  ;;  %v197_v1 = vld [vmem:[%s939_s1 + $0x10] sm:$0xff]  ;;  %v200_v2 = vld [vmem:[%s939_s1 + $0x28] sm:$0xff]  ;;  %s943_s13 = smov (!%p161_p3, %s660_s13), 1  ;;  %vm222_vm0 = vcmask 130048   ;;  %vm216_vm1 = vcmask 1046528  }
   0xc   : > { %726 = vmatpush.msra.mxu2 %v198_v0  ;;  %725 = vmatpush.msra.mxu1 %v198_v0  ;;  %v196_v3 = vld [vmem:[%s939_s1 + $0x8] sm:$0xff]  ;;  %v202_v4 = vld [vmem:[%s939_s1 + $0x38] sm:$0xff]  ;;  %v201_v5 = vld [vmem:[%s939_s1 + $0x30] sm:$0xff]  ;;  %s729_s30 = smul.u32 52, %s943_s13  ;;  %vm333_vm2 = vcmask 1045504   ;;  %vm377_vm3 = vcmask 1044480  }
   0xd   : > { %243 = vmatpush.msra.mxu0 %v198_v0  ;;  %359 = vmatpush.msra.mxu3 %v202_v4  ;;  %v199_v6 = vld [vmem:[%s939_s1 + $0x20] sm:$0xff]  ;;  %v204_v8 = vld [vmem:[%s939_s1 + $0x48] sm:$0xff]  ;;  %v210_v9 = vld [vmem:[%s939_s1 + $0x78] sm:$0xff]  ;;  %vm499_vm4 = vcmask 1041408   ;;  %vm458_vm5 = vcmask 1042432   ;;  %s730_s4 = smul.u32 12, %s943_s13 }
   0xe   : > { %728 = vmatpush.msra.mxu2 %v197_v1  ;;  %727 = vmatpush.msra.mxu1 %v197_v1  ;;  %v195_v7 = vld [vmem:[%s939_s1] sm:$0xff]  ;;  %s165_s10 = scalar_lea.vmem %s938_s0, %s729_s30  ;;  %v209_v11 = vld [vmem:[%s939_s1 + $0x70] sm:$0xff]  ;;  %v208_v26 = vld [vmem:[%s939_s1 + $0x68] sm:$0xff]  ;;  %vm596_vm6 = vcmask 257024   ;;  %vm599_vm7 = vcmask 254976  }
   0xf   : > { %244 = vmatpush.msra.mxu0 %v197_v1  ;;  %360 = vmatpush.msra.mxu3 %v201_v5  ;;  %v203_v10 = vld [vmem:[%s939_s1 + $0x40] sm:$0xff]  ;;  %v818_v12 = vld [vmem:[%s165_s10 + $0x10] sm:$0xff]   ;;  %v820_v14 = vld [vmem:[%s165_s10 + $0x8] sm:$0xff]   ;;  %s170_s7 = scalar_lea.vmem %s941_s3, %s730_s4  ;;  %vm600_vm8 = vsmask.f32 1280 }
  0x10   : > { %315 = vmatpush.msrb.mxu2 %v200_v2  ;;  %278 = vmatpush.msrb.mxu1 %v196_v3  ;;  %v697_v13 = vld [vmem:[%s165_s10] sm:$0xff]   ;;  %v706_v15 = vunpack.c.l.bf16 %v818_v12  ;;  %v707_v16 = vunpack.c.h.bf16 %v818_v12  ;;  %v826_v18 = vld [vmem:[%s165_s10 + $0x18] sm:$0xff]   ;;  %v703_v20 = vunpack.c.h.bf16 %v820_v14  ;;  %v724_v27 = vld [vmem:[%s165_s10 + $0x28] sm:$0xff]   ;;  %v702_v48 = vunpack.c.l.bf16 %v820_v14 }
  0x11   : > { %403 = vmatpush.msrb.mxu0 %v204_v8  ;;  %527 = vmatpush.msrb.mxu3 %v210_v9  ;;  %v824_v17 = vunpack.c.l.bf16 %v697_v13  ;;  %v828_v19 = vunpack.c.h.bf16 %v697_v13  ;;  %v832_v21 = vunpack.c.l.bf16 %v826_v18  ;;  %v711_v22 = vunpack.c.h.bf16 %v826_v18  ;;  %v835_v23 = vld [vmem:[%s165_s10 + $0x20] sm:$0xff]   ;;  %v206_v33 = vld [vmem:[%s939_s1 + $0x58] sm:$0xff]  ;;  %v212_v36 = vld [vmem:[%s939_s1 + $0x88] sm:$0xff] }
  0x12   : > { %316 = vmatpush.msrb.mxu2 %v199_v6  ;;  %279 = vmatpush.msrb.mxu1 %v195_v7  ;;  %v220_v24 = vrot.slane %v707_v16, 1  ;;  %v218_v25 = vrot.slane %v706_v15, 1  ;;  %v217_v28 = vrot.slane %v703_v20, 1  ;;  %v714_v34 = vunpack.c.l.bf16 %v835_v23  ;;  %v207_v41 = vld [vmem:[%s939_s1 + $0x60] sm:$0xff]  ;;  %v205_v42 = vld [vmem:[%s939_s1 + $0x50] sm:$0xff]  ;;  %vm601_vm9 = vmand %vm599_vm7, %vm600_vm8 }
  0x13   : > { %404 = vmatpush.msrb.mxu0 %v203_v10  ;;  %528 = vmatpush.msrb.mxu3 %v209_v11  ;;  %v334_v29 = vrot.slane %v832_v21, 2  ;;  %v335_v30 = vrot.slane %v711_v22, 2  ;;  %v290_v32 = vrot.slane %v824_v17, 1  ;;  %v715_v35 = vunpack.c.h.bf16 %v835_v23  ;;  %v211_v43 = vld [vmem:[%s939_s1 + $0x80] sm:$0xff] }
  0x14   : > { %669 = vmatmul.msk.f32.vlgmr.msra.gmra.mxu2 %vm222_vm0, %v220_v24  ;;  %v221_v31 = vsel %vm216_vm1, %v218_v25, %v220_v24  ;;  %v291_v37 = vrot.slane %v828_v19, 1  ;;  %v219_v38 = vsel %vm216_vm1, %v217_v28, %v218_v25  ;;  %v718_v40 = vunpack.c.l.bf16 %v724_v27 }
  0x15   : > { %668 = vmatmul.msk.f32.vlgmr.msra.gmra.mxu1 %vm222_vm0, %v221_v31  ;;  %484 = vmatpush.msra.mxu2 %v208_v26  ;;  %v336_v39 = vsel %vm333_vm2, %v334_v29, %v335_v30  ;;  %v337_v44 = vrot.slane %v714_v34, 2  ;;  %v378_v45 = vrot.slane %v715_v35, 3  ;;  %v719_v51 = vunpack.c.h.bf16 %v724_v27 }
  0x16   : > { %667 = vmatmul.msk.f32.vlgmr.msra.gmra.mxu0 %vm222_vm0, %v219_v38  ;;  %676 = vmatmul.msk.f32.vlgmr.msra.gmra.mxu3 %vm222_vm0, %v336_v39  ;;  %v379_v46 = vrot.slane %v718_v40, 3  ;;  %v292_v47 = vsel %vm216_vm1, %v290_v32, %v291_v37  ;;  %v293_v52 = vrot.slane %v702_v48, 1  ;;  %v500_v56 = vrot.slane %v703_v20, 6 }
  0x17   : > { %443 = vmatpush.msra.mxu1 %v206_v33  ;;  %568 = vmatpush.msra.mxu0 %v212_v36  ;;  %v338_v49 = vsel %vm333_vm2, %v335_v30, %v337_v44  ;;  %v381_v53 = vrot.slane %v719_v51, 3  ;;  %v501_v57 = vrot.slane %v706_v15, 6  ;;  %v459_v59 = vrot.slane %v824_v17, 5 }
  0x18   : > { %485 = vmatpush.msra.mxu2 %v207_v41  ;;  %v380_v50 = vsel %vm377_vm3, %v378_v45, %v379_v46  ;;  %v294_v54 = vsel %vm216_vm1, %v291_v37, %v293_v52  ;;  %v460_v60 = vrot.slane %v828_v19, 5  ;;  %v418_v61 = vrot.slane %v832_v21, 3 }
  0x19   : > { %444 = vmatpush.msra.mxu1 %v205_v42  ;;  %569 = vmatpush.msra.mxu0 %v211_v43  ;;  %v382_v55 = vsel %vm377_vm3, %v379_v46, %v381_v53  ;;  %v502_v58 = vsel %vm499_vm4, %v500_v56, %v501_v57  ;;  %v419_v62 = vrot.slane %v711_v22, 3  ;;  %v503_v63 = vrot.slane %v707_v16, 6  ;;  %v739_v46 = vld [vmem:[%s940_s2] ss:$0 sm:$0xff] }
  0x1a   : > { %v542_v0 = vrot.slane %v824_v17, 6  ;;  %v543_v1 = vrot.slane %v828_v19, 6  ;;  %v461_v2 = vsel %vm458_vm5, %v459_v59, %v460_v60  ;;  %v462_v6 = vrot.slane %v702_v48, 5 }
  0x1b   : > { %v420_v3 = vsel %vm377_vm3, %v418_v61, %v419_v62  ;;  %v504_v4 = vsel %vm499_vm4, %v501_v57, %v503_v63  ;;  %v421_v7 = vrot.slane %v714_v34, 3  ;;  %v505_v8 = vrot.slane %v832_v21, 6 }
  0x1c   : > { %673 = vmatmul.msk.f32.vlgmr.msrb.gmra.mxu2 %vm222_vm0, %v292_v47  ;;  %v544_v5 = vsel %vm499_vm4, %v542_v0, %v543_v1  ;;  %v545_v9 = vrot.slane %v702_v48, 6  ;;  %v463_v10 = vsel %vm458_vm5, %v460_v60, %v462_v6 }
  0x1d   : > { %670 = vmatmul.msk.f32.vlgmr.msrb.gmra.mxu1 %vm222_vm0, %v824_v17  ;;  %v422_v11 = vsel %vm377_vm3, %v419_v62, %v421_v7  ;;  %v506_v12 = vsel %vm499_vm4, %v503_v63, %v505_v8 }
  0x1e   : > { %677 = vmatmul.msk.f32.gmra.mxu3 %vm222_vm0, %v338_v49  ;;  %679 = vmatmul.msk.f32.vlgmr.msrb.gmra.mxu0 %vm222_vm0, %v380_v50  ;;  %v546_v13 = vsel %vm499_vm4, %v543_v1, %v545_v9  ;;  %v547_v14 = vsel %vm499_vm4, %v545_v9, %v500_v56 }
  0x24   : > { %674 = vmatmul.msk.f32.gmra.mxu2 %vm222_vm0, %v294_v54 }
  0x25   : > { %671 = vmatmul.msk.f32.gmra.mxu1 %vm222_vm0, %v828_v19 }
  0x26   : > { %678 = vmatmul.msk.f32.gmra.mxu3 %vm222_vm0, %v337_v44  ;;  %680 = vmatmul.msk.f32.gmra.mxu0 %vm222_vm0, %v382_v55 }
  0x2c   : > { %675 = vmatmul.msk.f32.gmra.mxu2 %vm222_vm0, %v293_v52 }
  0x2d   : > { %672 = vmatmul.msk.f32.gmra.mxu1 %vm222_vm0, %v702_v48 }
  0x2e   : > { %681 = vmatmul.msk.f32.gmra.mxu0 %vm222_vm0, %v381_v53  ;;  %688 = vmatmul.msk.f32.vlgmr.msrb.gmra.mxu3 %vm222_vm0, %v502_v58 }
  0x34   : > { %685 = vmatmul.msk.f32.vlgmr.msra.gmra.mxu2 %vm222_vm0, %v461_v2 }
  0x35   : > { %682 = vmatmul.msk.f32.vlgmr.msra.gmra.mxu1 %vm222_vm0, %v420_v3 }
  0x36   : > { %689 = vmatmul.msk.f32.gmra.mxu3 %vm222_vm0, %v504_v4  ;;  %691 = vmatmul.msk.f32.vlgmr.msra.gmra.mxu0 %vm222_vm0, %v544_v5 }
  0x3c   : > { %686 = vmatmul.msk.f32.gmra.mxu2 %vm222_vm0, %v463_v10 }
  0x3d   : > { %683 = vmatmul.msk.f32.gmra.mxu1 %vm222_vm0, %v422_v11  ;;  %v602_v11 = vld [vmem:[%s170_s7 + $0x8] sm:$0x3] }
  0x3e   : > { %690 = vmatmul.msk.f32.gmra.mxu3 %vm222_vm0, %v506_v12  ;;  %692 = vmatmul.msk.f32.gmra.mxu0 %vm222_vm0, %v546_v13 }
  0x44   : > { %687 = vmatmul.msk.f32.gmra.mxu2 %vm222_vm0, %v462_v6 }
  0x45   : > { %684 = vmatmul.msk.f32.gmra.mxu1 %vm222_vm0, %v421_v7 }
  0x46   : > { %693 = vmatmul.msk.f32.gmra.mxu0 %vm222_vm0, %v547_v14 }
  0x92   : > { %v249_v15 = vpop.f32.mrf.mxu1 }
  0x93   : > { %v246_v16 = vpop.f32.mrf.mxu0 }
  0x97   : > { %v252_v17 = vpop.f32.mrf.mxu2 }
  0x99   : > { %v362_v18 = vpop.f32.mrf.mxu3 }
  0x9a   : > { %v281_v19 = vpop.f32.mrf.mxu1 }
  0x9b   : > { %v406_v20 = vpop.f32.mrf.mxu0  ;;  %v282_v27 = vadd.f32 %v281_v19, %v246_v16 }
  0x9f   : > { %v318_v21 = vpop.f32.mrf.mxu2 }
  0xa0   : > { %v327_v30 = vadd.f32 %v318_v21, %v282_v27 }
  0xa1   : > { %v365_v22 = vpop.f32.mrf.mxu3 }
  0xa2   : > { %v284_v23 = vpop.f32.mrf.mxu1  ;;  %v371_v32 = vadd.f32 %v362_v18, %v327_v30 }
  0xa3   : > { %v409_v24 = vpop.f32.mrf.mxu0  ;;  %v285_v33 = vadd.f32 %v284_v23, %v249_v15 }
  0xa4   : > { %v415_v36 = vadd.f32 %v406_v20, %v371_v32 }
  0xa7   : > { %v321_v25 = vpop.f32.mrf.mxu2 }
  0xa8   : > { %v328_v37 = vadd.f32 %v321_v25, %v285_v33 }
  0xa9   : > { %v368_v26 = vpop.f32.mrf.mxu3 }
  0xaa   : > { %v287_v28 = vpop.f32.mrf.mxu1  ;;  %v372_v41 = vadd.f32 %v365_v22, %v328_v37 }
  0xab   : > { %v412_v29 = vpop.f32.mrf.mxu0  ;;  %v288_v43 = vadd.f32 %v287_v28, %v252_v17 }
  0xac   : > { %v416_v47 = vadd.f32 %v409_v24, %v372_v41 }
  0xaf   : > { %v324_v31 = vpop.f32.mrf.mxu2 }
  0xb0   : > { %v329_v48 = vadd.f32 %v324_v31, %v288_v43 }
  0xb1   : > { %v530_v35 = vpop.f32.mrf.mxu3 }
  0xb2   : > { %v446_v34 = vpop.f32.mrf.mxu1  ;;  %v373_v55 = vadd.f32 %v368_v26, %v329_v48 }
  0xb3   : > { %v571_v38 = vpop.f32.mrf.mxu0  ;;  %v455_v39 = vadd.f32 %v446_v34, %v415_v36 }
  0xb4   : > { %v417_v61 = vadd.f32 %v412_v29, %v373_v55 }
  0xb7   : > { %v487_v40 = vpop.f32.mrf.mxu2 }
  0xb8   : > { %v496_v42 = vadd.f32 %v487_v40, %v455_v39 }
  0xb9   : > { %v533_v50 = vpop.f32.mrf.mxu3 }
  0xba   : > { %v539_v44 = vadd.f32 %v530_v35, %v496_v42  ;;  %v449_v45 = vpop.f32.mrf.mxu1 }
  0xbb   : > { %v456_v51 = vadd.f32 %v449_v45, %v416_v47  ;;  %v574_v54 = vpop.f32.mrf.mxu0 }
  0xbc   : > { %v580_v49 = vadd.f32 %v571_v38, %v539_v44 }
  0xbe   : > { %v587_v52 = vadd.f32 %v739_v46, %v580_v49 }
  0xbf   : > { %v490_v53 = vpop.f32.mrf.mxu2 }
  0xc0   : > { %v590_v56 = vmax.f32 %v587_v52, 0.0  ;;  %v497_v57 = vadd.f32 %v490_v53, %v456_v51 }
  0xc1   : > { %v536_v2 = vpop.f32.mrf.mxu3 }
  0xc2   : > { %v593_v58 = vpack.c.bf16 %v590_v56, %v590_v56  ;;  %v540_v59 = vadd.f32 %v533_v50, %v497_v57  ;;  %v452_v60 = vpop.f32.mrf.mxu1 }
  0xc3   : > { %v457_v63 = vadd.f32 %v452_v60, %v417_v61  ;;  %v577_v5 = vpop.f32.mrf.mxu0 }
  0xc4   : > { %597 = vst.msk [vmem:[%s170_s7] sm:$0xf] %vm596_vm6, %v593_v58  ;;  %v581_v62 = vadd.f32 %v574_v54, %v540_v59 }
  0xc6   : > { %v588_v0 = vadd.f32 %v739_v46, %v581_v62 }
  0xc7   : > { %v493_v1 = vpop.f32.mrf.mxu2 }
  0xc8   : > { %v591_v3 = vmax.f32 %v588_v0, 0.0  ;;  %v498_v4 = vadd.f32 %v493_v1, %v457_v63 }
  0xca   : > { %v594_v6 = vpack.c.bf16 %v591_v3, %v591_v3  ;;  %v541_v7 = vadd.f32 %v536_v2, %v498_v4 }
  0xcc   : > { %598 = vst.msk [vmem:[%s170_s7 + $0x4] sm:$0xf] %vm596_vm6, %v594_v6  ;;  %v582_v8 = vadd.f32 %v577_v5, %v541_v7 }
  0xce   : > { %v589_v9 = vadd.f32 %v739_v46, %v582_v8 }
  0xd0   : > { %v592_v10 = vmax.f32 %v589_v9, 0.0 }
  0xd2   : > { %v595_v12 = vpack.c.bf16 %v592_v10, %v592_v10 }
  0xd4   : > { %v603_v13 = vsel %vm601_vm9, %v595_v12, %v602_v11 }
  0xd5   : > { %604 = vst [vmem:[%s170_s7 + $0x8] sm:$0x3] %v603_v13 }
  0xd6 PF: > { %s13_s12 = sadd.s32 1, %s746_s12  }
  0xd7   : > { %p10_p4 = scmp.ge.s32.totalorder %s13_s12, 4  }
  0xd9   :  { %12 = sbr.rel (!%p10_p4) target bundleno = 1 (0x1), region = 62 }

// kernel: squeeze.1
= control target key start
LH: loop header
LB: loop body
LE: loop exit
PB: predicated region body
PF: predicated region fallthrough
CT: control target
= control target key end

     0   :  { %s144_s0 = inlined_call_operand.vmem [shape: s32[2,256], index: 0, kind: input, shape index: {}]   ;;  %s145_s1 = inlined_call_operand.hbm [shape: s32[2,16,16], index: 1, kind: output, shape index: {}]  }
   0x1   :  { %v73_v0 = vld [vmem:[%s144_s0 + $0x2] sm:$0x3]  ;;  %v9_v1 = vld [vmem:[%s144_s0] sm:$0x3] }
   0x2   :  { %8 = vst [vmem:[#allocation2 + $0x8] sm:$0x3] %v73_v0 }
   0x3   :  { %10 = vst [vmem:[#allocation2] sm:$0x3] %v9_v1 }
   0x4   :  { %2 = vsyncpa [#allocation1], 0  ;;  %s108_s0 = smov 112   ;;  %s109_s10 = smov 80   ;;  %vm12_vm0 = vcmask 130048  }
   0x5   :  { %s110_s11 = smov 48   ;;  %s111_s12 = smov 96  }
   0x6   :  { %s112_s13 = smov 64   ;;  %s113_s14 = smov 32  }
   0x7   :  { %s114_s15 = smov 16   ;;  %s115_s16 = smov [#allocation0]  }
   0x8   :  { %s64_s17 = sshll.u32 %s115_s16, 4  ;;  %s66_s1 = sshll.u32 %s145_s1, 4  ;;  %s65_s17 = int_to_ptr.vmem [resolvable:$true] %s64_s17  ;;  %s67_s1 = int_to_ptr.hbm [resolvable:$true] %s66_s1 }
   0x9   :  { %v15_v5 = vld [vmem:[#allocation2 + $0x8] sm:$0x3]  }
   0xa   :  { %v19_v2 = vld.sshfl [vmem:[#allocation2] sm:$0xff pattern:$0x99999180]   ;;  %18 = vst.msk [vmem:[#allocation0 + $0x8] ss:$16 sm:$0x3] %vm12_vm0, %v15_v5  }
   0xb   :  { %20 = vrot.lane.b32.xlu0 %v19_v2, %s108_s0  ;;  %32 = vrot.lane.b32.xlu1 %v19_v2, %s109_s10  ;;  %v11_v4 = vld [vmem:[#allocation2] sm:$0x3]  }
   0xc   :  { %44 = vrot.lane.b32.xlu2 %v19_v2, %s110_s11  ;;  %13 = vst.msk [vmem:[#allocation0] ss:$16 sm:$0x3] %vm12_vm0, %v11_v4  }
  0x13   :  { %26 = vrot.lane.b32.xlu0 %v19_v2, %s111_s12  ;;  %38 = vrot.lane.b32.xlu1 %v19_v2, %s112_s13 }
  0x14   :  { %50 = vrot.lane.b32.xlu2 %v19_v2, %s113_s14 }
  0x1b   :  { %56 = vrot.lane.b32.xlu0 %v19_v2, %s114_s15 }
  0x66   :  { %v45_v3 = vpop.permute.xlu2 %44  }
  0x67   :  { %48 = vst.msk [vmem:[#allocation0 + $0x5] ss:$8 sm:$0xf] %vm12_vm0, %v45_v3  }
  0x6e   :  { %v51_v6 = vpop.permute.xlu2 %50  }
  0x6f   :  { %54 = vst.msk [vmem:[#allocation0 + $0x6] ss:$8 sm:$0xf] %vm12_vm0, %v51_v6  }
  0x7d   :  { %v21_v7 = vpop.permute.xlu0 %20   ;;  %v33_v8 = vpop.permute.xlu1 %32  }
  0x7e   :  { %24 = vst.msk [vmem:[#allocation0 + $0x1] ss:$8 sm:$0xf] %vm12_vm0, %v21_v7  }
  0x7f   :  { %36 = vst.msk [vmem:[#allocation0 + $0x3] ss:$8 sm:$0xf] %vm12_vm0, %v33_v8  }
  0x85   :  { %v27_v9 = vpop.permute.xlu0 %26   ;;  %v39_v10 = vpop.permute.xlu1 %38  }
  0x86   :  { %30 = vst.msk [vmem:[#allocation0 + $0x2] ss:$8 sm:$0xf] %vm12_vm0, %v27_v9  }
  0x87   :  { %42 = vst.msk [vmem:[#allocation0 + $0x4] ss:$8 sm:$0xf] %vm12_vm0, %v39_v10  }
  0x8d   :  { %v57_v11 = vpop.permute.xlu0 %56  }
  0x8e   :  { %60 = vst.msk [vmem:[#allocation0 + $0x7] ss:$8 sm:$0xf] %vm12_vm0, %v57_v11  }
  0x8f   :  { %69 = dma.vmem_to_hbm [thread:$0]  %s65_s17, 512, %s67_s1, [#allocation1]  }
  0x90   :  { %106 = dma.done.wait [#allocation1], 512  }
  0x91   :  { %107 = vsyncadd [#allocation1], 4294966784 }
  0x92   :  { %72 = vsyncpa [#allocation1], 1 }

// kernel: combined_model_forward.6
= control target key start
LH: loop header
LB: loop body
LE: loop exit
PB: predicated region body
PF: predicated region fallthrough
CT: control target
= control target key end

     0   :  { %s1038_s27 = smov 0   ;;  %s1310_s0 = inlined_call_operand.vmem [shape: bf16[2,36,32], index: 0, kind: input, shape index: {}]   ;;  %s1311_s1 = inlined_call_operand.vmem [shape: f32[288,64], index: 1, kind: input, shape index: {}]   ;;  %s1312_s2 = inlined_call_operand.vmem [shape: f32[1,64], index: 2, kind: input, shape index: {}]   ;;  %s1313_s3 = inlined_call_operand.vmem [shape: f32[64,2], index: 3, kind: input, shape index: {}]   ;;  %s1314_s4 = inlined_call_operand.vmem [shape: f32[1,2], index: 4, kind: input, shape index: {}]   ;;  %s1315_s5 = inlined_call_operand.vmem [shape: f32[64,4], index: 5, kind: input, shape index: {}]   ;;  %s1316_s6 = inlined_call_operand.vmem [shape: f32[1,4], index: 6, kind: input, shape index: {}]   ;;  %s1317_s7 = inlined_call_operand.vmem [shape: f32[2,22,2], index: 7, kind: output, shape index: {0}]   ;;  %s1318_s8 = inlined_call_operand.vmem [shape: f32[2,22,4], index: 8, kind: output, shape index: {1}]  }
   0x1 LB: > { %s912_s28 = sadd.s32 4294967295, %s991_s27   ;;  %p916_p0 = scmp.ge.s32.totalorder %s991_s27, 1  ;;  %s991_s27 = sphi %s1038_s27, %s19_s27  }
   0x2   : > { %p265_p1 = scmp.lt.s32.totalorder %s991_s27, 3 }
   0x4   : > { %p266_p2 = pnand %p916_p0, %p265_p1 }
   0x5   : > { %p304_p3 = scmp.lt.s32.totalorder (!%p266_p2), %s912_s28, 1 }
   0x6   : > { %269 = sbr.rel (%p266_p2) target bundleno = 356 (0x164), region = 48 }
   0xb   : > { %v332_v0 = vld [vmem:[%s1311_s1 + $0x18] sm:$0xff]  ;;  %v331_v2 = vld [vmem:[%s1311_s1 + $0x10] sm:$0xff]  ;;  %v330_v5 = vld [vmem:[%s1311_s1 + $0x8] sm:$0xff]  ;;  %s1320_s28 = smov (!%p304_p3, %s912_s28), 1  ;;  %vm374_vm0 = vcmask 261120   ;;  %vm368_vm1 = vcmask 1046528  }
   0xc   : > { %v336_v1 = vld [vmem:[%s1311_s1 + $0x38] sm:$0xff]  ;;  %425 = vmatpush.msra.mxu1 %v332_v0  ;;  %v335_v4 = vld [vmem:[%s1311_s1 + $0x30] sm:$0xff]  ;;  %v334_v7 = vld [vmem:[%s1311_s1 + $0x28] sm:$0xff]  ;;  %s972_s29 = smul.u32 20, %s1320_s28  ;;  %vm439_vm2 = vcmask 1045504   ;;  %vm524_vm3 = vcmask 1040384  }
   0xd   : > { %393 = vmatpush.msra.mxu0 %v336_v1  ;;  %v340_v3 = vld [vmem:[%s1311_s1 + $0x58] sm:$0xff]  ;;  %964 = vmatpush.msra.mxu3 %v336_v1  ;;  %v339_v6 = vld [vmem:[%s1311_s1 + $0x50] sm:$0xff]  ;;  %v338_v8 = vld [vmem:[%s1311_s1 + $0x48] sm:$0xff]  ;;  %vm481_vm4 = vcmask 1041408   ;;  %vm599_vm5 = vcmask 1043456   ;;  %vm642_vm6 = vcmask 1042432  }
   0xe   : > { %463 = vmatpush.msra.mxu2 %v340_v3  ;;  %426 = vmatpush.msra.mxu1 %v331_v2  ;;  %v329_v9 = vld [vmem:[%s1311_s1] sm:$0xff]  ;;  %s1088_s14 = scalar_lea.vmem %s1310_s0, %s972_s29  ;;  %v344_v12 = vld [vmem:[%s1311_s1 + $0x78] sm:$0xff]  ;;  %v347_v20 = vld [vmem:[%s1311_s1 + $0x90] sm:$0xff]  ;;  %vm740_vm7 = vcmask 523264   ;;  %s973_s19 = smul.u32 24, %s1320_s28  ;;  %vm776_vm8 = vcmask 15360  }
   0xf   : > { %394 = vmatpush.msra.mxu0 %v335_v4  ;;  %965 = vmatpush.msra.mxu3 %v335_v4  ;;  %v333_v10 = vld [vmem:[%s1311_s1 + $0x20] sm:$0xff]  ;;  %v348_v13 = vld [vmem:[%s1311_s1 + $0x98] sm:$0xff]  ;;  %v1098_v15 = vld [vmem:[%s1088_s14 + $0x8] sm:$0xff]   ;;  %vm819_vm9 = vcmask 31744   ;;  %vm779_vm10 = vcmask 13312   ;;  %vm822_vm11 = vcmask 29696  }
  0x10   : > { %464 = vmatpush.msra.mxu2 %v339_v6  ;;  %427 = vmatpush.msra.mxu1 %v330_v5  ;;  %v337_v11 = vld [vmem:[%s1311_s1 + $0x40] sm:$0xff]  ;;  %v356_v16 = vld [vmem:[%s1311_s1 + $0xd8] sm:$0xff]  ;;  %v1108_v19 = vunpack.c.l.bf16 %v1098_v15  ;;  %v343_v21 = vld [vmem:[%s1311_s1 + $0x70] sm:$0xff]  ;;  %v962_v55 = vunpack.c.h.bf16 %v1098_v15  ;;  %s313_s24 = scalar_lea.vmem %s1317_s7, %s973_s19  ;;  %s318_s28 = scalar_lea.vmem %s1318_s8, %s973_s19 }
  0x11   : > { %395 = vmatpush.msra.mxu0 %v334_v7  ;;  %966 = vmatpush.msra.mxu3 %v334_v7  ;;  %v956_v14 = vld [vmem:[%s1088_s14] sm:$0xff]   ;;  %v355_v22 = vld [vmem:[%s1311_s1 + $0xd0] sm:$0xff]  ;;  %v346_v28 = vld [vmem:[%s1311_s1 + $0x88] sm:$0xff] }
  0x12   : > { %465 = vmatpush.msra.mxu2 %v338_v8  ;;  %428 = vmatpush.msra.mxu1 %v329_v9  ;;  %v1103_v17 = vunpack.c.l.bf16 %v956_v14  ;;  %v1105_v18 = vunpack.c.h.bf16 %v956_v14  ;;  %v372_v25 = vrot.slane %v1108_v19, 1  ;;  %v342_v29 = vld [vmem:[%s1311_s1 + $0x68] sm:$0xff]  ;;  %v352_v30 = vld [vmem:[%s1311_s1 + $0xb8] sm:$0xff]  ;;  %v345_v35 = vld [vmem:[%s1311_s1 + $0x80] sm:$0xff]  ;;  %v443_v39 = vrot.slane %v1108_v19, 2 }
  0x13   : > { %396 = vmatpush.msra.mxu0 %v333_v10  ;;  %967 = vmatpush.msra.mxu3 %v333_v10  ;;  %v354_v33 = vld [vmem:[%s1311_s1 + $0xc8] sm:$0xff]  ;;  %v341_v38 = vld [vmem:[%s1311_s1 + $0x60] sm:$0xff]  ;;  %v360_v40 = vld [vmem:[%s1311_s1 + $0xf8] sm:$0xff]  ;;  %v528_v51 = vrot.slane %v1108_v19, 7  ;;  %v485_v60 = vrot.slane %v1108_v19, 6  ;;  %v530_v61 = vrot.slane %v962_v55, 7 }
  0x14   : > { %466 = vmatpush.msra.mxu2 %v337_v11  ;;  %923 = vmatmul.msk.f32.vlgmr.msra.gmra.mxu1 %vm374_vm0, %v1103_v17  ;;  %v369_v23 = vrot.slane %v1103_v17, 1  ;;  %v370_v24 = vrot.slane %v1105_v18, 1  ;;  %v440_v26 = vrot.slane %v1103_v17, 2  ;;  %v441_v27 = vrot.slane %v1105_v18, 2  ;;  %v351_v41 = vld [vmem:[%s1311_s1 + $0xb0] sm:$0xff]  ;;  %v353_v42 = vld [vmem:[%s1311_s1 + $0xc0] sm:$0xff] }
  0x15   : > { %507 = vmatpush.msrb.mxu3 %v344_v12  ;;  %550 = vmatpush.msrb.mxu0 %v348_v13  ;;  %v525_v36 = vrot.slane %v1103_v17, 7  ;;  %v526_v37 = vrot.slane %v1105_v18, 7  ;;  %v359_v43 = vld [vmem:[%s1311_s1 + $0xf0] sm:$0xff]  ;;  %v350_v46 = vld [vmem:[%s1311_s1 + $0xa8] sm:$0xff]  ;;  %v349_v48 = vld [vmem:[%s1311_s1 + $0xa0] sm:$0xff]  ;;  %v482_v49 = vrot.slane %v1103_v17, 6  ;;  %v531_v1 = vsel %vm524_vm3, %v528_v51, %v530_v61 }
  0x16   : > { %625 = vmatpush.msrb.mxu2 %v356_v16  ;;  %v371_v31 = vsel %vm368_vm1, %v369_v23, %v370_v24  ;;  %v373_v32 = vsel %vm368_vm1, %v370_v24, %v372_v25  ;;  %968 = vmatpush.msrb.mxu1 %v352_v30  ;;  %v442_v34 = vsel %vm439_vm2, %v440_v26, %v441_v27  ;;  %v358_v47 = vld [vmem:[%s1311_s1 + $0xe8] sm:$0xff]  ;;  %v483_v50 = vrot.slane %v1105_v18, 6  ;;  %v357_v52 = vld [vmem:[%s1311_s1 + $0xe0] sm:$0xff]  ;;  %v364_v53 = vld [vmem:[%s1311_s1 + $0x118] sm:$0xff] }
  0x17   : > { %551 = vmatpush.msrb.mxu0 %v347_v20  ;;  %508 = vmatpush.msrb.mxu3 %v343_v21  ;;  %v527_v44 = vsel %vm524_vm3, %v525_v36, %v526_v37  ;;  %v444_v45 = vsel %vm439_vm2, %v441_v27, %v443_v39  ;;  %v363_v54 = vld [vmem:[%s1311_s1 + $0x110] sm:$0xff]  ;;  %v529_v57 = vsel %vm524_vm3, %v526_v37, %v528_v51  ;;  %v362_v58 = vld [vmem:[%s1311_s1 + $0x108] sm:$0xff]  ;;  %v361_v59 = vld [vmem:[%s1311_s1 + $0x100] sm:$0xff]  ;;  %v600_v62 = vrot.slane %v1105_v18, 4 }
  0x18   : > { %626 = vmatpush.msrb.mxu2 %v355_v22  ;;  %920 = vmatmul.msk.f32.vlgmr.msra.gmra.mxu0 %vm374_vm0, %v371_v31  ;;  %v484_v56 = vsel %vm481_vm4, %v482_v49, %v483_v50  ;;  %v601_v63 = vrot.slane %v1108_v19, 4  ;;  %v486_v0 = vsel %vm481_vm4, %v483_v50, %v485_v60  ;;  %v487_v3 = vrot.slane %v962_v55, 6  ;;  %v323_v5 = vld [vmem:[%s1088_s14 + $0x10] sm:$0x3]  ;;  %v788_v20 = vld [vmem:[%s1315_s5 + $0x38] sm:$0xff]  ;;  %v786_v23 = vld [vmem:[%s1315_s5 + $0x28] sm:$0xff] }
  0x19   : > { %921 = vmatmul.msk.f32.vlgmr.msra.gmra.mxu3 %vm374_vm0, %v373_v32  ;;  %926 = vmatmul.msk.f32.vlgmr.msra.gmra.mxu2 %vm374_vm0, %v442_v34  ;;  %v603_v4 = vrot.slane %v962_v55, 4  ;;  %v328_v8 = vunpack.c.l.bf16 %v323_v5  ;;  %v643_v9 = vrot.slane %v1105_v18, 5  ;;  %v644_v10 = vrot.slane %v1108_v19, 5  ;;  %v787_v22 = vld [vmem:[%s1315_s5 + $0x30] sm:$0xff]  ;;  %v735_v27 = vld [vmem:[%s1313_s3 + $0x38] sm:$0xff]  ;;  %v733_v31 = vld [vmem:[%s1313_s3 + $0x28] sm:$0xff] }
  0x1a   : > { %552 = vmatpush.msrb.mxu0 %v346_v28  ;;  %509 = vmatpush.msrb.mxu3 %v342_v29  ;;  %v602_v2 = vsel %vm599_vm5, %v600_v62, %v601_v63  ;;  %v488_v6 = vsel %vm481_vm4, %v485_v60, %v487_v3  ;;  %v646_v14 = vrot.slane %v962_v55, 5  ;;  %v785_v28 = vld [vmem:[%s1315_s5 + $0x20] sm:$0xff]  ;;  %v734_v29 = vld [vmem:[%s1313_s3 + $0x30] sm:$0xff]  ;;  %v731_v36 = vld [vmem:[%s1313_s3 + $0x18] sm:$0xff] }
  0x1b   : > { %627 = vmatpush.msrb.mxu2 %v354_v33  ;;  %969 = vmatpush.msrb.mxu1 %v351_v41  ;;  %v604_v7 = vsel %vm599_vm5, %v601_v63, %v603_v4  ;;  %v605_v11 = vrot.slane %v328_v8, 4  ;;  %v645_v12 = vsel %vm642_vm6, %v643_v9, %v644_v10  ;;  %v648_v16 = vrot.slane %v328_v8, 5  ;;  %v732_v33 = vld [vmem:[%s1313_s3 + $0x20] sm:$0xff] }
  0x1c   : > { %553 = vmatpush.msrb.mxu0 %v345_v35  ;;  %510 = vmatpush.msrb.mxu3 %v341_v38  ;;  %v647_v15 = vsel %vm642_vm6, %v644_v10, %v646_v14  ;;  %v685_v17 = vrot.slane %v328_v8, 6  ;;  %v783_v35 = vld [vmem:[%s1315_s5 + $0x10] sm:$0xff] }
  0x1d   : > { %924 = vmatmul.msk.f32.gmra.mxu1 %vm374_vm0, %v1105_v18  ;;  %628 = vmatpush.msrb.mxu2 %v353_v42  ;;  %v606_v13 = vsel %vm599_vm5, %v603_v4, %v605_v11  ;;  %v781_v42 = vld [vmem:[%s1315_s5] sm:$0xff] }
  0x1e   : > { %581 = vmatpush.msra.mxu0 %v352_v30  ;;  %668 = vmatpush.msra.mxu3 %v360_v40  ;;  %v784_v30 = vld [vmem:[%s1315_s5 + $0x18] sm:$0xff]  ;;  %v782_v40 = vld [vmem:[%s1315_s5 + $0x8] sm:$0xff]  ;;  %v982_v4 = vld [vmem:[%s1312_s2] ss:$0 sm:$0xff] }
  0x1f   : > { %970 = vmatpush.msrb.mxu1 %v350_v46  ;;  %801 = vmatpush.msra.mxu2 %v788_v20 }
  0x20   : > { %582 = vmatpush.msra.mxu0 %v351_v41  ;;  %669 = vmatpush.msra.mxu3 %v359_v43  ;;  %v729_v41 = vld [vmem:[%s1313_s3 + $0x8] sm:$0xff] }
  0x21   : > { %922 = vmatmul.msk.f32.gmra.mxu3 %vm374_vm0, %v372_v25  ;;  %932 = vmatmul.msk.f32.vlgmr.msrb.gmra.mxu0 %vm374_vm0, %v527_v44  ;;  %v728_v44 = vld [vmem:[%s1313_s3] sm:$0xff] }
  0x22   : > { %927 = vmatmul.msk.f32.gmra.mxu2 %vm374_vm0, %v444_v45  ;;  %583 = vmatpush.msra.mxu0 %v350_v46 }
  0x23   : > { %670 = vmatpush.msra.mxu3 %v358_v47  ;;  %971 = vmatpush.msrb.mxu1 %v349_v48 }
  0x24   : > { %584 = vmatpush.msra.mxu0 %v349_v48  ;;  %802 = vmatpush.msra.mxu2 %v787_v22 }
  0x25   : > { %671 = vmatpush.msra.mxu3 %v357_v52  ;;  %925 = vmatmul.msk.f32.gmra.mxu1 %vm374_vm0, %v1108_v19 }
  0x26   : > { %701 = vmatpush.msrb.mxu0 %v364_v53  ;;  %803 = vmatpush.msra.mxu2 %v786_v23 }
  0x27   : > { %758 = vmatpush.msra.mxu1 %v735_v27 }
  0x28   : > { %702 = vmatpush.msrb.mxu0 %v363_v54  ;;  %804 = vmatpush.msra.mxu2 %v785_v28 }
  0x29   : > { %929 = vmatmul.msk.f32.vlgmr.msrb.gmra.mxu3 %vm374_vm0, %v484_v56  ;;  %933 = vmatmul.msk.f32.gmra.mxu0 %vm374_vm0, %v529_v57 }
  0x2a   : > { %928 = vmatmul.msk.f32.gmra.mxu2 %vm374_vm0, %v443_v39  ;;  %703 = vmatpush.msrb.mxu0 %v362_v58  ;;  %v730_v39 = vld [vmem:[%s1313_s3 + $0x10] sm:$0xff] }
  0x2b   : > { %759 = vmatpush.msra.mxu1 %v734_v29  ;;  %805 = vmatpush.msra.mxu2 %v784_v30  ;;  %v983_v30 = vld [vmem:[%s1314_s4] ss:$0 sm:$0xff] }
  0x2c   : > { %704 = vmatpush.msrb.mxu0 %v361_v59 }
  0x2d   : > { %936 = vmatmul.msk.f32.vlgmr.msrb.gmra.mxu1 %vm374_vm0, %v1108_v19  ;;  %v686_v19 = vsel %vm481_vm4, %v487_v3, %v685_v17  ;;  %806 = vmatpush.msra.mxu2 %v783_v35 }
  0x2e   : > { %760 = vmatpush.msra.mxu1 %v733_v31 }
  0x2f   : > { %807 = vmatpush.msra.mxu2 %v782_v40 }
  0x30   : > { %761 = vmatpush.msra.mxu1 %v732_v33  ;;  %v984_v33 = vld [vmem:[%s1316_s6] ss:$0 sm:$0xff] }
  0x31   : > { %930 = vmatmul.msk.f32.gmra.mxu3 %vm374_vm0, %v486_v0  ;;  %934 = vmatmul.msk.f32.gmra.mxu0 %vm374_vm0, %v531_v1 }
  0x32   : > { %938 = vmatmul.msk.f32.vlgmr.msrb.gmra.mxu2 %vm374_vm0, %v602_v2  ;;  %762 = vmatpush.msra.mxu1 %v731_v36 }
  0x33   : > { %808 = vmatpush.msra.mxu2 %v781_v42 }
  0x34   : > { %763 = vmatpush.msra.mxu1 %v730_v39 }
  0x35   : > { %937 = vmatmul.msk.f32.gmra.mxu1 %vm374_vm0, %v962_v55 }
  0x36   : > { %764 = vmatpush.msra.mxu1 %v729_v41 }
  0x38   : > { %765 = vmatpush.msra.mxu1 %v728_v44 }
  0x39   : > { %931 = vmatmul.msk.f32.gmra.mxu3 %vm374_vm0, %v488_v6  ;;  %935 = vmatmul.msk.f32.vlgmr.msra.gmra.mxu0 %vm374_vm0, %v1105_v18  ;;  %v649_v18 = vsel %vm642_vm6, %v646_v14, %v648_v16 }
  0x3a   : > { %939 = vmatmul.msk.f32.gmra.mxu2 %vm374_vm0, %v604_v7 }
  0x41   : > { %941 = vmatmul.msk.f32.vlgmr.msra.gmra.mxu3 %vm374_vm0, %v645_v12  ;;  %944 = vmatmul.msk.f32.vlgmr.msrb.gmra.mxu0 %vm374_vm0, %v486_v0 }
  0x42   : > { %940 = vmatmul.msk.f32.gmra.mxu2 %vm374_vm0, %v606_v13 }
  0x49   : > { %942 = vmatmul.msk.f32.gmra.mxu3 %vm374_vm0, %v647_v15  ;;  %945 = vmatmul.msk.f32.gmra.mxu0 %vm374_vm0, %v488_v6 }
  0x51   : > { %943 = vmatmul.msk.f32.gmra.mxu3 %vm374_vm0, %v649_v18  ;;  %946 = vmatmul.msk.f32.gmra.mxu0 %vm374_vm0, %v686_v19 }
  0x91   : > { %v430_v37 = vpop.f32.mrf.mxu1 }
  0x95   : > { %v398_v21 = vpop.f32.mrf.mxu0 }
  0x96   : > { %v431_v48 = vadd.f32 %v430_v37, %v398_v21 }
  0x9a   : > { %v433_v46 = vpop.f32.mrf.mxu1 }
  0x9c   : > { %v401_v24 = vpop.f32.mrf.mxu3  ;;  %v468_v25 = vpop.f32.mrf.mxu2 }
  0x9d   : > { %v477_v50 = vadd.f32 %v468_v25, %v431_v48  ;;  %v434_v56 = vadd.f32 %v433_v46, %v401_v24 }
  0x9e   : > { %v555_v26 = vpop.f32.mrf.mxu0 }
  0xa2   : > { %v436_v53 = vpop.f32.mrf.mxu1 }
  0xa4   : > { %v404_v32 = vpop.f32.mrf.mxu3 }
  0xa5   : > { %v471_v38 = vpop.f32.mrf.mxu2  ;;  %v437_v1 = vadd.f32 %v436_v53, %v404_v32 }
  0xa6   : > { %v558_v34 = vpop.f32.mrf.mxu0  ;;  %v478_v58 = vadd.f32 %v471_v38, %v434_v56 }
  0xaa   : > { %v589_v63 = vpop.f32.mrf.mxu1 }
  0xac   : > { %v512_v43 = vpop.f32.mrf.mxu3 }
  0xad   : > { %v474_v47 = vpop.f32.mrf.mxu2  ;;  %v521_v52 = vadd.f32 %v512_v43, %v477_v50 }
  0xae   : > { %v561_v45 = vpop.f32.mrf.mxu0  ;;  %v479_v6 = vadd.f32 %v474_v47, %v437_v1 }
  0xaf   : > { %v564_v57 = vadd.f32 %v555_v26, %v521_v52 }
  0xb2   : > { %v592_v17 = vpop.f32.mrf.mxu1 }
  0xb4   : > { %v515_v49 = vpop.f32.mrf.mxu3 }
  0xb5   : > { %v630_v54 = vpop.f32.mrf.mxu2  ;;  %v522_v61 = vadd.f32 %v515_v49, %v478_v58 }
  0xb6   : > { %v586_v51 = vpop.f32.mrf.mxu0 }
  0xb7   : > { %v595_v59 = vadd.f32 %v586_v51, %v564_v57  ;;  %v565_v2 = vadd.f32 %v558_v34, %v522_v61 }
  0xb9   : > { %v639_v62 = vadd.f32 %v630_v54, %v595_v59  ;;  %v596_v8 = vadd.f32 %v589_v63, %v565_v2 }
  0xbc   : > { %v518_v55 = vpop.f32.mrf.mxu3 }
  0xbd   : > { %v633_v5 = vpop.f32.mrf.mxu2  ;;  %v523_v9 = vadd.f32 %v518_v55, %v479_v6 }
  0xbe   : > { %v706_v60 = vpop.f32.mrf.mxu0  ;;  %v640_v12 = vadd.f32 %v633_v5, %v596_v8 }
  0xbf   : > { %v566_v15 = vadd.f32 %v561_v45, %v523_v9 }
  0xc1   : > { %v597_v20 = vadd.f32 %v592_v17, %v566_v15 }
  0xc4   : > { %v673_v0 = vpop.f32.mrf.mxu3 }
  0xc5   : > { %v682_v3 = vadd.f32 %v673_v0, %v639_v62  ;;  %v636_v19 = vpop.f32.mrf.mxu2 }
  0xc6   : > { %v709_v11 = vpop.f32.mrf.mxu0  ;;  %v641_v22 = vadd.f32 %v636_v19, %v597_v20 }
  0xc7   : > { %v715_v7 = vadd.f32 %v706_v60, %v682_v3 }
  0xc9   : > { %v722_v10 = vadd.f32 %v982_v4, %v715_v7 }
  0xcb   : > { %v725_v13 = vmax.f32 %v722_v10, 0.0 }
  0xcc   : > { %v676_v14 = vpop.f32.mrf.mxu3 }
  0xcd   : > { %v683_v16 = vadd.f32 %v676_v14, %v640_v12  ;;  %947 = vmatmul.msk.f32.vlgmr.msra.gmra.mxu1 %vm740_vm7, %v725_v13  ;;  %950 = vmatmul.msk.f32.vlgmr.msra.gmra.mxu2 %vm740_vm7, %v725_v13 }
  0xce   : > { %v712_v25 = vpop.f32.mrf.mxu0 }
  0xcf   : > { %v716_v18 = vadd.f32 %v709_v11, %v683_v16 }
  0xd1   : > { %v723_v21 = vadd.f32 %v982_v4, %v716_v18 }
  0xd3   : > { %v726_v23 = vmax.f32 %v723_v21, 0.0 }
  0xd4   : > { %v679_v24 = vpop.f32.mrf.mxu3 }
  0xd5   : > { %v684_v26 = vadd.f32 %v679_v24, %v641_v22  ;;  %948 = vmatmul.msk.f32.gmra.mxu1 %vm740_vm7, %v726_v23  ;;  %951 = vmatmul.msk.f32.gmra.mxu2 %vm740_vm7, %v726_v23 }
  0xd7   : > { %v717_v27 = vadd.f32 %v712_v25, %v684_v26 }
  0xd9   : > { %v724_v28 = vadd.f32 %v982_v4, %v717_v27 }
  0xdb   : > { %v727_v29 = vmax.f32 %v724_v28, 0.0 }
  0xdd   : > { %949 = vmatmul.msk.f32.gmra.mxu1 %vm740_vm7, %v727_v29  ;;  %952 = vmatmul.msk.f32.gmra.mxu2 %vm740_vm7, %v727_v29 }
 0x14a   : > { %v767_v31 = vpop.f32.mrf.mxu1 }
 0x14b   : > { %v768_v32 = vadd.f32 %v983_v30, %v767_v31 }
 0x14d   : > { %777 = vst.msk [vmem:[%s313_s24] sm:$0xff] %vm776_vm8, %v768_v32 }
 0x150   : > { %v810_v34 = vpop.f32.mrf.mxu2 }
 0x151   : > { %v811_v35 = vadd.f32 %v984_v33, %v810_v34 }
 0x152   : > { %v770_v36 = vpop.f32.mrf.mxu1 }
 0x153   : > { %820 = vst.msk [vmem:[%s318_s28] sm:$0xff] %vm819_vm9, %v811_v35  ;;  %v771_v37 = vadd.f32 %v983_v30, %v770_v36 }
 0x155   : > { %778 = vst.msk [vmem:[%s313_s24 + $0x8] sm:$0xff] %vm776_vm8, %v771_v37 }
 0x158   : > { %v813_v38 = vpop.f32.mrf.mxu2 }
 0x159   : > { %v814_v39 = vadd.f32 %v984_v33, %v813_v38 }
 0x15a   : > { %v773_v40 = vpop.f32.mrf.mxu1 }
 0x15b   : > { %821 = vst.msk [vmem:[%s318_s28 + $0x8] sm:$0xff] %vm819_vm9, %v814_v39  ;;  %v774_v41 = vadd.f32 %v983_v30, %v773_v40 }
 0x15d   : > { %780 = vst.msk [vmem:[%s313_s24 + $0x10] sm:$0x3f] %vm779_vm10, %v774_v41 }
 0x160   : > { %v816_v42 = vpop.f32.mrf.mxu2 }
 0x161   : > { %v817_v43 = vadd.f32 %v984_v33, %v816_v42 }
 0x163   : > { %823 = vst.msk [vmem:[%s318_s28 + $0x10] sm:$0x3f] %vm822_vm11, %v817_v43 }
 0x164 PF: > { %s19_s27 = sadd.s32 1, %s991_s27  }
 0x165   : > { %p16_p4 = scmp.ge.s32.totalorder %s19_s27, 4  }
 0x167   :  { %18 = sbr.rel (!%p16_p4) target bundleno = 1 (0x1), region = 90 }

// kernel: combined_model_forward.7
= control target key start
LH: loop header
LB: loop body
LE: loop exit
PB: predicated region body
PF: predicated region fallthrough
CT: control target
= control target key end

     0   :  { %s573_s12 = smov 0   ;;  %s575_s13 = smov 0   ;;  %s622_s0 = inlined_call_operand.vmem [shape: f32[2,2,256], index: 0, kind: input, shape index: {}]   ;;  %s623_s1 = inlined_call_operand.vmem [shape: f32[2,4,256], index: 1, kind: input, shape index: {}]   ;;  %s624_s2 = inlined_call_operand.vmem [shape: s32[2,1,256], index: 2, kind: output, shape index: {0}]   ;;  %s625_s3 = inlined_call_operand.vmem [shape: f32[2,4,256], index: 3, kind: output, shape index: {1}]  }
   0x1   :  { %s577_s14 = smov 0  }
   0x2 LB: > { %s26_s15 = sadd.s32 1, %s546_s13  ;;  %p490_p0 = scmp.ge.s32.totalorder %s550_s14, 1  ;;  %s550_s14 = sphi %s577_s14, %s14_s14   ;;  %s546_s13 = sphi %s575_s13, %s627_s13   ;;  %s542_s12 = sphi %s573_s12, %s626_s12  }
   0x3   : > { %p28_p1 = scmp.ge.s32.totalorder %s26_s15, 2  ;;  %p180_p2 = scmp.lt.s32.totalorder %s550_s14, 3 }
   0x5   : > { %s629_s15 = smov (%p28_p1, %s26_s15), 0  ;;  %p181_p3 = pnand %p490_p0, %p180_p2 }
   0x6   : > { %p230_p4 = scmp.lt.s32.totalorder (!%p181_p3), %s542_s12, 1 }
   0x7   : > { %184 = sbr.rel (%p181_p3) target bundleno = 67 (0x43), region = 28 }
   0xc   : > { %s631_s12 = smov (!%p230_p4, %s542_s12), 1  ;;  %vm275_vm0 = vcmask 1041408   ;;  %v290_v11 = vlaneseq  ;;  %v552_v12 = vmov 269488144   ;;  %vm327_vm8 = vcmask 1040384  }
   0xd   : > { %s500_s16 = sshll.u32 %s631_s12, 2  ;;  %s501_s20 = sshll.u32 %s631_s12, 3  ;;  %v299_v13 = vunpack.c.l.s4 %v552_v12 }
   0xe   : > { %s237_s19 = scalar_lea.vmem %s622_s0, %s500_s16  ;;  %s247_s23 = scalar_lea.vmem %s623_s1, %s501_s20  ;;  %v291_v20 = vshrl.u32 %v290_v11, 7  ;;  %vm331_vm9 = vcmp.lt.s32.totalorder %v290_v11, 256 }
   0xf   : > { %v268_v0 = vld [vmem:[%s237_s19] sm:$0xf]  ;;  %s266_s26 = scalar_lea.vmem %s625_s3, %s501_s20  ;;  %v300_v21 = vunpack.c.0.s8 %v299_v13  ;;  %s495_s27 = sshll.u32 %s631_s12, 1 }
  0x10   : > { %270 = vst [vmem:[#allocation1] ss:$4 sm:$0xff] %v268_v0  ;;  %v334_v16 = vld [vmem:[%s247_s23] sm:$0xff]  ;;  %s256_s30 = scalar_lea.vmem %s624_s2, %s495_s27 }
  0x11   : > { %v335_v17 = vmax.f32 %v334_v16, 0.0  ;;  %v301_v25 = vperm.slane %v291_v20, %v300_v21 }
  0x13   : > { %336 = vst [vmem:[%s266_s26] sm:$0xff] %v335_v17 }
  0x17   : > { %v271_v1 = vld.sshfl [vmem:[#allocation1] sm:$0xff pattern:$0x73625140]  ;;  %v272_v2 = vld.sshfl [vmem:[#allocation1 + $0x8] sm:$0xff pattern:$0x73625140] }
  0x18   : > { %v276_v3 = vsel %vm275_vm0, %v271_v1, -inf  ;;  %v283_v4 = vsel %vm275_vm0, %v272_v2, -inf }
  0x19   : > { %v277_v5 = vrot.slane %v276_v3, 4  ;;  %v284_v6 = vrot.slane %v283_v4, 4 }
  0x1b   : > { %v278_v7 = vmax.f32 %v276_v3, %v277_v5  ;;  %v285_v8 = vmax.f32 %v283_v4, %v284_v6 }
  0x1d   : > { %v279_v9 = vrot.slane %v278_v7, 2  ;;  %v286_v10 = vrot.slane %v285_v8, 2 }
  0x1f   : > { %v280_v14 = vmax.f32 %v278_v7, %v279_v9  ;;  %v287_v15 = vmax.f32 %v285_v8, %v286_v10 }
  0x21   : > { %v281_v18 = vrot.slane %v280_v14, 1  ;;  %v288_v19 = vrot.slane %v287_v15, 1 }
  0x23   : > { %v289_v22 = vmax.f32 %v287_v15, %v288_v19  ;;  %v282_v23 = vmax.f32 %v280_v14, %v281_v18 }
  0x25   : > { %v294_v24 = vrot.slane %v289_v22, 6 }
  0x27   : > { %v295_v26 = vsel %vm275_vm0, %v282_v23, %v294_v24 }
  0x28   : > { %vm297_vm1 = vcmp.ge.f32.partialorder %v268_v0, %v295_v26 }
  0x29   : > { %v302_v27 = vsel %vm297_vm1, %v301_v25, 2 }
  0x2a   : > { %303 = vst [vmem:[#allocation1] ss:$4 sm:$0xff] %v302_v27 }
  0x31   : > { %v304_v28 = vld.sshfl [vmem:[#allocation1] sm:$0xff pattern:$0x73625140]  ;;  %v305_v29 = vld.sshfl [vmem:[#allocation1 + $0x8] sm:$0xff pattern:$0x73625140] }
  0x32   : > { %v306_v30 = vsel %vm275_vm0, %v304_v28, 2147483647  ;;  %v316_v31 = vsel %vm275_vm0, %v305_v29, 2147483647 }
  0x33   : > { %v307_v32 = vrot.slane %v306_v30, 4  ;;  %v317_v33 = vrot.slane %v316_v31, 4 }
  0x35   : > { %vm308_vm2 = vcmp.lt.s32.totalorder %v306_v30, %v307_v32  ;;  %vm318_vm3 = vcmp.lt.s32.totalorder %v316_v31, %v317_v33 }
  0x36   : > { %v309_v34 = vsel %vm308_vm2, %v306_v30, %v307_v32  ;;  %v319_v35 = vsel %vm318_vm3, %v316_v31, %v317_v33 }
  0x37   : > { %v310_v36 = vrot.slane %v309_v34, 2  ;;  %v320_v37 = vrot.slane %v319_v35, 2 }
  0x39   : > { %vm311_vm4 = vcmp.lt.s32.totalorder %v309_v34, %v310_v36  ;;  %vm321_vm5 = vcmp.lt.s32.totalorder %v319_v35, %v320_v37 }
  0x3a   : > { %v312_v38 = vsel %vm311_vm4, %v309_v34, %v310_v36  ;;  %v322_v39 = vsel %vm321_vm5, %v319_v35, %v320_v37 }
  0x3b   : > { %v313_v40 = vrot.slane %v312_v38, 1  ;;  %v323_v41 = vrot.slane %v322_v39, 1 }
  0x3d   : > { %vm314_vm6 = vcmp.lt.s32.totalorder %v312_v38, %v313_v40  ;;  %vm324_vm7 = vcmp.lt.s32.totalorder %v322_v39, %v323_v41 }
  0x3e   : > { %v325_v42 = vsel %vm324_vm7, %v322_v39, %v323_v41  ;;  %v315_v44 = vsel %vm314_vm6, %v312_v38, %v313_v40 }
  0x3f   : > { %v326_v43 = vrot.slane %v325_v42, 7 }
  0x41   : > { %v328_v45 = vsel %vm327_vm8, %v315_v44, %v326_v43 }
  0x42   : > { %333 = vst.msk [vmem:[%s256_s30] sm:$0x3] %vm331_vm9, %v328_v45 }
  0x43 PF: > { %s14_s14 = sadd.s32 1, %s550_s14   ;;  %s626_s12 = smov %s546_s13 }
  0x44   : > { %p11_p5 = scmp.ge.s32.totalorder %s14_s14, 4   ;;  %s627_s13 = smov %s629_s15 }
  0x46   :  { %13 = sbr.rel (!%p11_p5) target bundleno = 2 (0x2), region = 73 }

</bundles_post_ra>
